<compile_context>
chip_gen: v6e
topology: v6e:2x2x1
jax: 0.10.0
libtpu: 0.0.40
codegen_flags: <defaults>
</compile_context>

<pallas_src>
import numpy as np

import jax
import jax.numpy as jnp
from jax.experimental import pallas as pl
from jax.experimental.pallas import tpu as pltpu


# ---------------------------------------------------------------------------
# Small helpers (trace-time only; no XLA ops besides free reshapes).
# ---------------------------------------------------------------------------
def _round_up(n, m):
    return ((n + m - 1) // m) * m


def _canon(x):
    """Layout-preserving rank canonicalization.

    Collapses all dims before the last two (free for TPU tiled layouts since
    leading dims are untiled) and lifts 0-/1-D inputs to 2-D.  No padding, no
    concatenation, no copies.
    """
    if x.ndim == 0:
        return x.reshape(1, 1)
    if x.ndim == 1:
        return x.reshape(1, x.shape[0])
    if x.ndim > 3:
        return x.reshape(-1, x.shape[-2], x.shape[-1])
    return x


def _padded_vmem_bytes(x):
    """VMEM footprint of a canonicalized (<=3-D) array with (8,128) tiling."""
    shape = x.shape
    lead = int(np.prod(shape[:-2])) if len(shape) > 2 else 1
    sub = _round_up(int(shape[-2]), 8)
    lane = _round_up(int(shape[-1]), 128)
    return lead * sub * lane * x.dtype.itemsize


def _full_sum_f32(x):
    """Full reduction of a <=3-D array in f32.

    Leading (untiled) dim is reduced with pure VPU adds; the final 2-D
    reduction is a single cross-lane/sublane reduce (XLU).
    """
    x = x.astype(jnp.float32)
    while x.ndim > 2:
        x = jnp.sum(x, axis=0)
    return jnp.sum(x)


# ---------------------------------------------------------------------------
# Fused kernel builder.  One kernel invocation (no grid) computes all ~17
# loss terms; each input ref is the whole (VMEM-resident) tensor.
#   bucket 0 (mel):       sum_t  mean|x_t - y_t|                      (1 term)
#   bucket 1 (feature):   sum_t  mean|x_t - y_t| * feature_loss_scale
#   bucket 2 (generator): sum_t  mean((x_t - 1)^2) * generator_loss_scale
# The 1/n and scale factors are baked in as trace-time constants (term_meta).
# ---------------------------------------------------------------------------
def _make_fused_kernel(term_meta):
    """term_meta: list of (kind, weight); kind in {"mel", "feat", "gen"}."""

    def kernel(*refs):
        in_refs = refs[:-1]
        o_ref = refs[-1]

        mel = jnp.float32(0.0)
        feat = jnp.float32(0.0)
        gen = jnp.float32(0.0)

        i = 0
        for kind, w in term_meta:
            if kind == "gen":
                # (1 - dg)^2 == (dg - 1)^2 ; the "-1" is applied here so no
                # ones-like tensor is ever materialized in HBM.
                d = in_refs[i][...].astype(jnp.float32) - 1.0
                i += 1
                gen = gen + _full_sum_f32(d * d) * w
            else:
                d = (in_refs[i][...].astype(jnp.float32)
                     - in_refs[i + 1][...].astype(jnp.float32))
                i += 2
                s = _full_sum_f32(jnp.abs(d)) * w
                if kind == "mel":
                    mel = mel + s
                else:
                    feat = feat + s

        o_ref[0, 0] = mel
        o_ref[0, 1] = feat
        o_ref[0, 2] = gen

    return kernel


# ---------------------------------------------------------------------------
# GeneratorLoss forward (functional JAX equivalent of the nn.Module).
# ---------------------------------------------------------------------------
class GeneratorLoss:
    def __init__(self, generator_loss_scale, mel_loss_scale, feature_loss_scale):
        self.generator_loss_scale = float(generator_loss_scale)
        self.mel_loss_scale = float(mel_loss_scale)
        self.feature_loss_scale = float(feature_loss_scale)

    def __call__(self, mel_true, mel_fake,
                 mp_features_true, mp_features_fake,
                 ms_features_true, ms_features_fake,
                 mp_outputs_fake, ms_outputs_fake, **kwargs):
        arrays = []
        term_meta = []
        vmem_bytes = 0

        def add_term(kind, scale, x, y=None):
            nonlocal vmem_bytes
            xs = _canon(x)
            arrays.append(xs)
            vmem_bytes += _padded_vmem_bytes(xs)
            if y is not None:
                ys = _canon(y)
                arrays.append(ys)
                vmem_bytes += _padded_vmem_bytes(ys)
            n = max(int(x.size), 1)
            term_meta.append((kind, scale / n))

        # Mel L1 (raw mean; mel_loss_scale is applied to the total below so the
        # reported 'mel_loss' stays unscaled, matching the torch module).
        add_term("mel", 1.0, mel_true, mel_fake)

        # Feature-matching L1 terms (multi-period + multi-scale).
        for t_list, f_list in ((mp_features_true, mp_features_fake),
                               (ms_features_true, ms_features_fake)):
            for t_sub, f_sub in zip(t_list, f_list):
                for t, f in zip(t_sub, f_sub):
                    add_term("feat", self.feature_loss_scale, t, f)

        # Generator GAN terms: mean((1 - dg)^2) * scale ; the "-1" is handled
        # in-kernel (no ones tensor).
        for outs in (mp_outputs_fake, ms_outputs_fake):
            for dg in outs:
                add_term("gen", self.generator_loss_scale, dg)

        # Keep headroom but never exceed what v7x can actually provide.
        vmem_limit = int(min(48 << 20, max(32 << 20, 2 * vmem_bytes + (2 << 20))))

        # TODO(synk): for inputs whose summed VMEM footprint exceeds ~40 MiB,
        # fall back to a chunked streaming variant (scalar-prefetched offset
        # table + manual make_async_copy double buffering per term), and on
        # v7x split the terms across the two TensorCores via pl.core_map.
        sums = pl.pallas_call(
            _make_fused_kernel(term_meta),
            out_shape=jax.ShapeDtypeStruct((1, 3), jnp.float32),
            in_specs=[pl.BlockSpec(memory_space=pltpu.MemorySpace.VMEM)
                      for _ in arrays],
            out_specs=pl.BlockSpec(memory_space=pltpu.MemorySpace.SMEM),
            compiler_params=pltpu.CompilerParams(vmem_limit_bytes=vmem_limit),
        )(*arrays)

        loss_mel = sums[0, 0]
        feat_total = sums[0, 1]     # mp_feature_loss + ms_feature_loss
        gen_total = sums[0, 2]      # mp_generator_loss + ms_generator_loss

        sg = jax.lax.stop_gradient  # mirrors torch .detach()
        # TODO(synk): pallas_call has no autodiff rule; if gradients through
        # 'generator_loss' are required, wrap this forward in jax.custom_vjp
        # (bwd: sign(d)*w for the L1 buckets, 2*(dg-1)*w for the MSE bucket).
        return {
            "generator_loss": gen_total + feat_total
                              + loss_mel * self.mel_loss_scale,
            "mel_loss": sg(loss_mel),
            "feature_loss": sg(feat_total) / self.feature_loss_scale,
            "generator_gan_loss": sg(gen_total) / self.generator_loss_scale,
        }


# ---------------------------------------------------------------------------
# Pure-JAX reference (for verification only).
# ---------------------------------------------------------------------------
def _reference(loss_fn, mel_true, mel_fake, mp_ft, mp_ff, ms_ft, ms_ff,
               mp_of, ms_of):
    l1 = lambda a, b: jnp.mean(jnp.abs(a - b))
    feat = lambda tl, fl: sum(l1(t, f) * loss_fn.feature_loss_scale
                              for ts, fs in zip(tl, fl)
                              for t, f in zip(ts, fs))
    gen = lambda outs: sum(jnp.mean((1.0 - dg) ** 2)
                           * loss_fn.generator_loss_scale for dg in outs)
    mp_feat, ms_feat = feat(mp_ft, mp_ff), feat(ms_ft, ms_ff)
    mp_gen, ms_gen = gen(mp_of), gen(ms_of)
    loss_mel = l1(mel_true, mel_fake)
    return {
        "generator_loss": ms_gen + mp_gen + ms_feat + mp_feat
                          + loss_mel * loss_fn.mel_loss_scale,
        "mel_loss": loss_mel,
        "feature_loss": (mp_feat + ms_feat) / loss_fn.feature_loss_scale,
        "generator_gan_loss": (ms_gen + mp_gen) / loss_fn.generator_loss_scale,
    }


if __name__ == "__main__":
    loss_fn = GeneratorLoss(generator_loss_scale=1.0,
                            mel_loss_scale=45.0,
                            feature_loss_scale=2.0)

    key = jax.random.PRNGKey(0)
    keys = iter(jax.random.split(key, 64))

    def rnd(shape):
        return jax.random.normal(next(keys), shape, dtype=jnp.float32)

    # Mel spectrograms: (B, n_mels, T)
    mel_true = rnd((2, 8, 32))
    mel_fake = rnd((2, 8, 32))

    # Multi-period discriminator features: 2 discriminators x 3 layers, NCHW.
    mp_shapes = [[(2, 4, 16, 8), (2, 8, 8, 8), (2, 16, 4, 8)],
                 [(2, 4, 12, 8), (2, 8, 6, 8), (2, 16, 3, 8)]]
    mp_features_true = [[rnd(s) for s in sub] for sub in mp_shapes]
    mp_features_fake = [[rnd(s) for s in sub] for sub in mp_shapes]

    # Multi-scale discriminator features: 2 discriminators x 3 layers, NCT.
    ms_shapes = [[(2, 4, 64), (2, 8, 32), (2, 16, 16)],
                 [(2, 4, 48), (2, 8, 24), (2, 16, 12)]]
    ms_features_true = [[rnd(s) for s in sub] for sub in ms_shapes]
    ms_features_fake = [[rnd(s) for s in sub] for sub in ms_shapes]

    # Discriminator outputs on fake audio.
    mp_outputs_fake = [rnd((2, 1, 24)), rnd((2, 1, 18))]
    ms_outputs_fake = [rnd((2, 1, 32)), rnd((2, 1, 16))]

    out = loss_fn(mel_true, mel_fake,
                  mp_features_true, mp_features_fake,
                  ms_features_true, ms_features_fake,
                  mp_outputs_fake, ms_outputs_fake)
    out = jax.block_until_ready(out)

    ref = _reference(loss_fn, mel_true, mel_fake,
                     mp_features_true, mp_features_fake,
                     ms_features_true, ms_features_fake,
                     mp_outputs_fake, ms_outputs_fake)
    for k in out:
        np.testing.assert_allclose(np.asarray(out[k]), np.asarray(ref[k]),
                                   rtol=2e-4, atol=1e-5)
    print("KERNEL_OK")
</pallas_src>

<mosaic_0001>
module attributes {stable_mosaic.version = 11 : i64} {
  func.func @kernel(%arg0: memref<2x8x32xf32, #tpu.memory_space<vmem>>, %arg1: memref<2x8x32xf32, #tpu.memory_space<vmem>>, %arg2: memref<8x16x8xf32, #tpu.memory_space<vmem>>, %arg3: memref<8x16x8xf32, #tpu.memory_space<vmem>>, %arg4: memref<16x8x8xf32, #tpu.memory_space<vmem>>, %arg5: memref<16x8x8xf32, #tpu.memory_space<vmem>>, %arg6: memref<32x4x8xf32, #tpu.memory_space<vmem>>, %arg7: memref<32x4x8xf32, #tpu.memory_space<vmem>>, %arg8: memref<8x12x8xf32, #tpu.memory_space<vmem>>, %arg9: memref<8x12x8xf32, #tpu.memory_space<vmem>>, %arg10: memref<16x6x8xf32, #tpu.memory_space<vmem>>, %arg11: memref<16x6x8xf32, #tpu.memory_space<vmem>>, %arg12: memref<32x3x8xf32, #tpu.memory_space<vmem>>, %arg13: memref<32x3x8xf32, #tpu.memory_space<vmem>>, %arg14: memref<2x4x64xf32, #tpu.memory_space<vmem>>, %arg15: memref<2x4x64xf32, #tpu.memory_space<vmem>>, %arg16: memref<2x8x32xf32, #tpu.memory_space<vmem>>, %arg17: memref<2x8x32xf32, #tpu.memory_space<vmem>>, %arg18: memref<2x16x16xf32, #tpu.memory_space<vmem>>, %arg19: memref<2x16x16xf32, #tpu.memory_space<vmem>>, %arg20: memref<2x4x48xf32, #tpu.memory_space<vmem>>, %arg21: memref<2x4x48xf32, #tpu.memory_space<vmem>>, %arg22: memref<2x8x24xf32, #tpu.memory_space<vmem>>, %arg23: memref<2x8x24xf32, #tpu.memory_space<vmem>>, %arg24: memref<2x16x12xf32, #tpu.memory_space<vmem>>, %arg25: memref<2x16x12xf32, #tpu.memory_space<vmem>>, %arg26: memref<2x1x24xf32, #tpu.memory_space<vmem>>, %arg27: memref<2x1x18xf32, #tpu.memory_space<vmem>>, %arg28: memref<2x1x32xf32, #tpu.memory_space<vmem>>, %arg29: memref<2x1x16xf32, #tpu.memory_space<vmem>>, %arg30: memref<1x3xf32, #tpu.memory_space<smem>>) attributes {dimension_semantics = [], scalar_prefetch = 0 : i64, scratch_operands = 0 : i64, tpu.core_type = #tpu.core_type<tc>} {
    %c0 = arith.constant 0 : index
    %c0_0 = arith.constant 0 : index
    %c0_1 = arith.constant 0 : index
    %0 = vector.load %arg0[%c0, %c0_0, %c0_1] : memref<2x8x32xf32, #tpu.memory_space<vmem>>, vector<2x8x32xf32>
    %c0_2 = arith.constant 0 : index
    %c0_3 = arith.constant 0 : index
    %c0_4 = arith.constant 0 : index
    %1 = vector.load %arg1[%c0_2, %c0_3, %c0_4] : memref<2x8x32xf32, #tpu.memory_space<vmem>>, vector<2x8x32xf32>
    %2 = arith.subf %0, %1 : vector<2x8x32xf32>
    %3 = math.absf %2 : vector<2x8x32xf32>
    %cst = arith.constant dense<0.000000e+00> : vector<8x32xf32>
    %4 = vector.multi_reduction <add>, %3, %cst [0] : vector<2x8x32xf32> to vector<8x32xf32>
    %5 = vector.shape_cast %4 : vector<8x32xf32> to vector<1x8x32xf32>
    %cst_5 = arith.constant dense<0.000000e+00> : vector<1xf32>
    %6 = vector.multi_reduction <add>, %5, %cst_5 [1, 2] : vector<1x8x32xf32> to vector<1xf32>
    %7 = vector.shape_cast %6 : vector<1xf32> to vector<1x1x1xf32>
    %8 = vector.extract %7[0, 0, 0] : f32 from vector<1x1x1xf32>
    %cst_6 = arith.constant 0.001953125 : f32
    %9 = arith.mulf %8, %cst_6 : f32
    %cst_7 = arith.constant 0.000000e+00 : f32
    %10 = arith.addf %cst_7, %9 : f32
    %c0_8 = arith.constant 0 : index
    %c0_9 = arith.constant 0 : index
    %c0_10 = arith.constant 0 : index
    %11 = vector.load %arg2[%c0_8, %c0_9, %c0_10] : memref<8x16x8xf32, #tpu.memory_space<vmem>>, vector<8x16x8xf32>
    %c0_11 = arith.constant 0 : index
    %c0_12 = arith.constant 0 : index
    %c0_13 = arith.constant 0 : index
    %12 = vector.load %arg3[%c0_11, %c0_12, %c0_13] : memref<8x16x8xf32, #tpu.memory_space<vmem>>, vector<8x16x8xf32>
    %13 = arith.subf %11, %12 : vector<8x16x8xf32>
    %14 = math.absf %13 : vector<8x16x8xf32>
    %cst_14 = arith.constant dense<0.000000e+00> : vector<16x8xf32>
    %15 = vector.multi_reduction <add>, %14, %cst_14 [0] : vector<8x16x8xf32> to vector<16x8xf32>
    %16 = vector.shape_cast %15 : vector<16x8xf32> to vector<1x16x8xf32>
    %cst_15 = arith.constant dense<0.000000e+00> : vector<1xf32>
    %17 = vector.multi_reduction <add>, %16, %cst_15 [1, 2] : vector<1x16x8xf32> to vector<1xf32>
    %18 = vector.shape_cast %17 : vector<1xf32> to vector<1x1x1xf32>
    %19 = vector.extract %18[0, 0, 0] : f32 from vector<1x1x1xf32>
    %cst_16 = arith.constant 0.001953125 : f32
    %20 = arith.mulf %19, %cst_16 : f32
    %cst_17 = arith.constant 0.000000e+00 : f32
    %21 = arith.addf %cst_17, %20 : f32
    %c0_18 = arith.constant 0 : index
    %c0_19 = arith.constant 0 : index
    %c0_20 = arith.constant 0 : index
    %22 = vector.load %arg4[%c0_18, %c0_19, %c0_20] : memref<16x8x8xf32, #tpu.memory_space<vmem>>, vector<16x8x8xf32>
    %c0_21 = arith.constant 0 : index
    %c0_22 = arith.constant 0 : index
    %c0_23 = arith.constant 0 : index
    %23 = vector.load %arg5[%c0_21, %c0_22, %c0_23] : memref<16x8x8xf32, #tpu.memory_space<vmem>>, vector<16x8x8xf32>
    %24 = arith.subf %22, %23 : vector<16x8x8xf32>
    %25 = math.absf %24 : vector<16x8x8xf32>
    %cst_24 = arith.constant dense<0.000000e+00> : vector<8x8xf32>
    %26 = vector.multi_reduction <add>, %25, %cst_24 [0] : vector<16x8x8xf32> to vector<8x8xf32>
    %27 = vector.shape_cast %26 : vector<8x8xf32> to vector<1x8x8xf32>
    %cst_25 = arith.constant dense<0.000000e+00> : vector<1xf32>
    %28 = vector.multi_reduction <add>, %27, %cst_25 [1, 2] : vector<1x8x8xf32> to vector<1xf32>
    %29 = vector.shape_cast %28 : vector<1xf32> to vector<1x1x1xf32>
    %30 = vector.extract %29[0, 0, 0] : f32 from vector<1x1x1xf32>
    %cst_26 = arith.constant 0.001953125 : f32
    %31 = arith.mulf %30, %cst_26 : f32
    %32 = arith.addf %21, %31 : f32
    %c0_27 = arith.constant 0 : index
    %c0_28 = arith.constant 0 : index
    %c0_29 = arith.constant 0 : index
    %33 = vector.load %arg6[%c0_27, %c0_28, %c0_29] : memref<32x4x8xf32, #tpu.memory_space<vmem>>, vector<32x4x8xf32>
    %c0_30 = arith.constant 0 : index
    %c0_31 = arith.constant 0 : index
    %c0_32 = arith.constant 0 : index
    %34 = vector.load %arg7[%c0_30, %c0_31, %c0_32] : memref<32x4x8xf32, #tpu.memory_space<vmem>>, vector<32x4x8xf32>
    %35 = arith.subf %33, %34 : vector<32x4x8xf32>
    %36 = math.absf %35 : vector<32x4x8xf32>
    %cst_33 = arith.constant dense<0.000000e+00> : vector<4x8xf32>
    %37 = vector.multi_reduction <add>, %36, %cst_33 [0] : vector<32x4x8xf32> to vector<4x8xf32>
    %38 = vector.shape_cast %37 : vector<4x8xf32> to vector<1x4x8xf32>
    %cst_34 = arith.constant dense<0.000000e+00> : vector<1xf32>
    %39 = vector.multi_reduction <add>, %38, %cst_34 [1, 2] : vector<1x4x8xf32> to vector<1xf32>
    %40 = vector.shape_cast %39 : vector<1xf32> to vector<1x1x1xf32>
    %41 = vector.extract %40[0, 0, 0] : f32 from vector<1x1x1xf32>
    %cst_35 = arith.constant 0.001953125 : f32
    %42 = arith.mulf %41, %cst_35 : f32
    %43 = arith.addf %32, %42 : f32
    %c0_36 = arith.constant 0 : index
    %c0_37 = arith.constant 0 : index
    %c0_38 = arith.constant 0 : index
    %44 = vector.load %arg8[%c0_36, %c0_37, %c0_38] : memref<8x12x8xf32, #tpu.memory_space<vmem>>, vector<8x12x8xf32>
    %c0_39 = arith.constant 0 : index
    %c0_40 = arith.constant 0 : index
    %c0_41 = arith.constant 0 : index
    %45 = vector.load %arg9[%c0_39, %c0_40, %c0_41] : memref<8x12x8xf32, #tpu.memory_space<vmem>>, vector<8x12x8xf32>
    %46 = arith.subf %44, %45 : vector<8x12x8xf32>
    %47 = math.absf %46 : vector<8x12x8xf32>
    %cst_42 = arith.constant dense<0.000000e+00> : vector<12x8xf32>
    %48 = vector.multi_reduction <add>, %47, %cst_42 [0] : vector<8x12x8xf32> to vector<12x8xf32>
    %49 = vector.shape_cast %48 : vector<12x8xf32> to vector<1x12x8xf32>
    %cst_43 = arith.constant dense<0.000000e+00> : vector<1xf32>
    %50 = vector.multi_reduction <add>, %49, %cst_43 [1, 2] : vector<1x12x8xf32> to vector<1xf32>
    %51 = vector.shape_cast %50 : vector<1xf32> to vector<1x1x1xf32>
    %52 = vector.extract %51[0, 0, 0] : f32 from vector<1x1x1xf32>
    %cst_44 = arith.constant 0.00260416674 : f32
    %53 = arith.mulf %52, %cst_44 : f32
    %54 = arith.addf %43, %53 : f32
    %c0_45 = arith.constant 0 : index
    %c0_46 = arith.constant 0 : index
    %c0_47 = arith.constant 0 : index
    %55 = vector.load %arg10[%c0_45, %c0_46, %c0_47] : memref<16x6x8xf32, #tpu.memory_space<vmem>>, vector<16x6x8xf32>
    %c0_48 = arith.constant 0 : index
    %c0_49 = arith.constant 0 : index
    %c0_50 = arith.constant 0 : index
    %56 = vector.load %arg11[%c0_48, %c0_49, %c0_50] : memref<16x6x8xf32, #tpu.memory_space<vmem>>, vector<16x6x8xf32>
    %57 = arith.subf %55, %56 : vector<16x6x8xf32>
    %58 = math.absf %57 : vector<16x6x8xf32>
    %cst_51 = arith.constant dense<0.000000e+00> : vector<6x8xf32>
    %59 = vector.multi_reduction <add>, %58, %cst_51 [0] : vector<16x6x8xf32> to vector<6x8xf32>
    %60 = vector.shape_cast %59 : vector<6x8xf32> to vector<1x6x8xf32>
    %cst_52 = arith.constant dense<0.000000e+00> : vector<1xf32>
    %61 = vector.multi_reduction <add>, %60, %cst_52 [1, 2] : vector<1x6x8xf32> to vector<1xf32>
    %62 = vector.shape_cast %61 : vector<1xf32> to vector<1x1x1xf32>
    %63 = vector.extract %62[0, 0, 0] : f32 from vector<1x1x1xf32>
    %cst_53 = arith.constant 0.00260416674 : f32
    %64 = arith.mulf %63, %cst_53 : f32
    %65 = arith.addf %54, %64 : f32
    %c0_54 = arith.constant 0 : index
    %c0_55 = arith.constant 0 : index
    %c0_56 = arith.constant 0 : index
    %66 = vector.load %arg12[%c0_54, %c0_55, %c0_56] : memref<32x3x8xf32, #tpu.memory_space<vmem>>, vector<32x3x8xf32>
    %c0_57 = arith.constant 0 : index
    %c0_58 = arith.constant 0 : index
    %c0_59 = arith.constant 0 : index
    %67 = vector.load %arg13[%c0_57, %c0_58, %c0_59] : memref<32x3x8xf32, #tpu.memory_space<vmem>>, vector<32x3x8xf32>
    %68 = arith.subf %66, %67 : vector<32x3x8xf32>
    %69 = math.absf %68 : vector<32x3x8xf32>
    %cst_60 = arith.constant dense<0.000000e+00> : vector<3x8xf32>
    %70 = vector.multi_reduction <add>, %69, %cst_60 [0] : vector<32x3x8xf32> to vector<3x8xf32>
    %71 = vector.shape_cast %70 : vector<3x8xf32> to vector<1x3x8xf32>
    %cst_61 = arith.constant dense<0.000000e+00> : vector<1xf32>
    %72 = vector.multi_reduction <add>, %71, %cst_61 [1, 2] : vector<1x3x8xf32> to vector<1xf32>
    %73 = vector.shape_cast %72 : vector<1xf32> to vector<1x1x1xf32>
    %74 = vector.extract %73[0, 0, 0] : f32 from vector<1x1x1xf32>
    %cst_62 = arith.constant 0.00260416674 : f32
    %75 = arith.mulf %74, %cst_62 : f32
    %76 = arith.addf %65, %75 : f32
    %c0_63 = arith.constant 0 : index
    %c0_64 = arith.constant 0 : index
    %c0_65 = arith.constant 0 : index
    %77 = vector.load %arg14[%c0_63, %c0_64, %c0_65] : memref<2x4x64xf32, #tpu.memory_space<vmem>>, vector<2x4x64xf32>
    %c0_66 = arith.constant 0 : index
    %c0_67 = arith.constant 0 : index
    %c0_68 = arith.constant 0 : index
    %78 = vector.load %arg15[%c0_66, %c0_67, %c0_68] : memref<2x4x64xf32, #tpu.memory_space<vmem>>, vector<2x4x64xf32>
    %79 = arith.subf %77, %78 : vector<2x4x64xf32>
    %80 = math.absf %79 : vector<2x4x64xf32>
    %cst_69 = arith.constant dense<0.000000e+00> : vector<4x64xf32>
    %81 = vector.multi_reduction <add>, %80, %cst_69 [0] : vector<2x4x64xf32> to vector<4x64xf32>
    %82 = vector.shape_cast %81 : vector<4x64xf32> to vector<1x4x64xf32>
    %cst_70 = arith.constant dense<0.000000e+00> : vector<1xf32>
    %83 = vector.multi_reduction <add>, %82, %cst_70 [1, 2] : vector<1x4x64xf32> to vector<1xf32>
    %84 = vector.shape_cast %83 : vector<1xf32> to vector<1x1x1xf32>
    %85 = vector.extract %84[0, 0, 0] : f32 from vector<1x1x1xf32>
    %cst_71 = arith.constant 3.906250e-03 : f32
    %86 = arith.mulf %85, %cst_71 : f32
    %87 = arith.addf %76, %86 : f32
    %c0_72 = arith.constant 0 : index
    %c0_73 = arith.constant 0 : index
    %c0_74 = arith.constant 0 : index
    %88 = vector.load %arg16[%c0_72, %c0_73, %c0_74] : memref<2x8x32xf32, #tpu.memory_space<vmem>>, vector<2x8x32xf32>
    %c0_75 = arith.constant 0 : index
    %c0_76 = arith.constant 0 : index
    %c0_77 = arith.constant 0 : index
    %89 = vector.load %arg17[%c0_75, %c0_76, %c0_77] : memref<2x8x32xf32, #tpu.memory_space<vmem>>, vector<2x8x32xf32>
    %90 = arith.subf %88, %89 : vector<2x8x32xf32>
    %91 = math.absf %90 : vector<2x8x32xf32>
    %cst_78 = arith.constant dense<0.000000e+00> : vector<8x32xf32>
    %92 = vector.multi_reduction <add>, %91, %cst_78 [0] : vector<2x8x32xf32> to vector<8x32xf32>
    %93 = vector.shape_cast %92 : vector<8x32xf32> to vector<1x8x32xf32>
    %cst_79 = arith.constant dense<0.000000e+00> : vector<1xf32>
    %94 = vector.multi_reduction <add>, %93, %cst_79 [1, 2] : vector<1x8x32xf32> to vector<1xf32>
    %95 = vector.shape_cast %94 : vector<1xf32> to vector<1x1x1xf32>
    %96 = vector.extract %95[0, 0, 0] : f32 from vector<1x1x1xf32>
    %cst_80 = arith.constant 3.906250e-03 : f32
    %97 = arith.mulf %96, %cst_80 : f32
    %98 = arith.addf %87, %97 : f32
    %c0_81 = arith.constant 0 : index
    %c0_82 = arith.constant 0 : index
    %c0_83 = arith.constant 0 : index
    %99 = vector.load %arg18[%c0_81, %c0_82, %c0_83] : memref<2x16x16xf32, #tpu.memory_space<vmem>>, vector<2x16x16xf32>
    %c0_84 = arith.constant 0 : index
    %c0_85 = arith.constant 0 : index
    %c0_86 = arith.constant 0 : index
    %100 = vector.load %arg19[%c0_84, %c0_85, %c0_86] : memref<2x16x16xf32, #tpu.memory_space<vmem>>, vector<2x16x16xf32>
    %101 = arith.subf %99, %100 : vector<2x16x16xf32>
    %102 = math.absf %101 : vector<2x16x16xf32>
    %cst_87 = arith.constant dense<0.000000e+00> : vector<16x16xf32>
    %103 = vector.multi_reduction <add>, %102, %cst_87 [0] : vector<2x16x16xf32> to vector<16x16xf32>
    %104 = vector.shape_cast %103 : vector<16x16xf32> to vector<1x16x16xf32>
    %cst_88 = arith.constant dense<0.000000e+00> : vector<1xf32>
    %105 = vector.multi_reduction <add>, %104, %cst_88 [1, 2] : vector<1x16x16xf32> to vector<1xf32>
    %106 = vector.shape_cast %105 : vector<1xf32> to vector<1x1x1xf32>
    %107 = vector.extract %106[0, 0, 0] : f32 from vector<1x1x1xf32>
    %cst_89 = arith.constant 3.906250e-03 : f32
    %108 = arith.mulf %107, %cst_89 : f32
    %109 = arith.addf %98, %108 : f32
    %c0_90 = arith.constant 0 : index
    %c0_91 = arith.constant 0 : index
    %c0_92 = arith.constant 0 : index
    %110 = vector.load %arg20[%c0_90, %c0_91, %c0_92] : memref<2x4x48xf32, #tpu.memory_space<vmem>>, vector<2x4x48xf32>
    %c0_93 = arith.constant 0 : index
    %c0_94 = arith.constant 0 : index
    %c0_95 = arith.constant 0 : index
    %111 = vector.load %arg21[%c0_93, %c0_94, %c0_95] : memref<2x4x48xf32, #tpu.memory_space<vmem>>, vector<2x4x48xf32>
    %112 = arith.subf %110, %111 : vector<2x4x48xf32>
    %113 = math.absf %112 : vector<2x4x48xf32>
    %cst_96 = arith.constant dense<0.000000e+00> : vector<4x48xf32>
    %114 = vector.multi_reduction <add>, %113, %cst_96 [0] : vector<2x4x48xf32> to vector<4x48xf32>
    %115 = vector.shape_cast %114 : vector<4x48xf32> to vector<1x4x48xf32>
    %cst_97 = arith.constant dense<0.000000e+00> : vector<1xf32>
    %116 = vector.multi_reduction <add>, %115, %cst_97 [1, 2] : vector<1x4x48xf32> to vector<1xf32>
    %117 = vector.shape_cast %116 : vector<1xf32> to vector<1x1x1xf32>
    %118 = vector.extract %117[0, 0, 0] : f32 from vector<1x1x1xf32>
    %cst_98 = arith.constant 0.00520833349 : f32
    %119 = arith.mulf %118, %cst_98 : f32
    %120 = arith.addf %109, %119 : f32
    %c0_99 = arith.constant 0 : index
    %c0_100 = arith.constant 0 : index
    %c0_101 = arith.constant 0 : index
    %121 = vector.load %arg22[%c0_99, %c0_100, %c0_101] : memref<2x8x24xf32, #tpu.memory_space<vmem>>, vector<2x8x24xf32>
    %c0_102 = arith.constant 0 : index
    %c0_103 = arith.constant 0 : index
    %c0_104 = arith.constant 0 : index
    %122 = vector.load %arg23[%c0_102, %c0_103, %c0_104] : memref<2x8x24xf32, #tpu.memory_space<vmem>>, vector<2x8x24xf32>
    %123 = arith.subf %121, %122 : vector<2x8x24xf32>
    %124 = math.absf %123 : vector<2x8x24xf32>
    %cst_105 = arith.constant dense<0.000000e+00> : vector<8x24xf32>
    %125 = vector.multi_reduction <add>, %124, %cst_105 [0] : vector<2x8x24xf32> to vector<8x24xf32>
    %126 = vector.shape_cast %125 : vector<8x24xf32> to vector<1x8x24xf32>
    %cst_106 = arith.constant dense<0.000000e+00> : vector<1xf32>
    %127 = vector.multi_reduction <add>, %126, %cst_106 [1, 2] : vector<1x8x24xf32> to vector<1xf32>
    %128 = vector.shape_cast %127 : vector<1xf32> to vector<1x1x1xf32>
    %129 = vector.extract %128[0, 0, 0] : f32 from vector<1x1x1xf32>
    %cst_107 = arith.constant 0.00520833349 : f32
    %130 = arith.mulf %129, %cst_107 : f32
    %131 = arith.addf %120, %130 : f32
    %c0_108 = arith.constant 0 : index
    %c0_109 = arith.constant 0 : index
    %c0_110 = arith.constant 0 : index
    %132 = vector.load %arg24[%c0_108, %c0_109, %c0_110] : memref<2x16x12xf32, #tpu.memory_space<vmem>>, vector<2x16x12xf32>
    %c0_111 = arith.constant 0 : index
    %c0_112 = arith.constant 0 : index
    %c0_113 = arith.constant 0 : index
    %133 = vector.load %arg25[%c0_111, %c0_112, %c0_113] : memref<2x16x12xf32, #tpu.memory_space<vmem>>, vector<2x16x12xf32>
    %134 = arith.subf %132, %133 : vector<2x16x12xf32>
    %135 = math.absf %134 : vector<2x16x12xf32>
    %cst_114 = arith.constant dense<0.000000e+00> : vector<16x12xf32>
    %136 = vector.multi_reduction <add>, %135, %cst_114 [0] : vector<2x16x12xf32> to vector<16x12xf32>
    %137 = vector.shape_cast %136 : vector<16x12xf32> to vector<1x16x12xf32>
    %cst_115 = arith.constant dense<0.000000e+00> : vector<1xf32>
    %138 = vector.multi_reduction <add>, %137, %cst_115 [1, 2] : vector<1x16x12xf32> to vector<1xf32>
    %139 = vector.shape_cast %138 : vector<1xf32> to vector<1x1x1xf32>
    %140 = vector.extract %139[0, 0, 0] : f32 from vector<1x1x1xf32>
    %cst_116 = arith.constant 0.00520833349 : f32
    %141 = arith.mulf %140, %cst_116 : f32
    %142 = arith.addf %131, %141 : f32
    %c0_117 = arith.constant 0 : index
    %c0_118 = arith.constant 0 : index
    %c0_119 = arith.constant 0 : index
    %143 = vector.load %arg26[%c0_117, %c0_118, %c0_119] : memref<2x1x24xf32, #tpu.memory_space<vmem>>, vector<2x1x24xf32>
    %cst_120 = arith.constant 1.000000e+00 : f32
    %144 = vector.broadcast %cst_120 : f32 to vector<2x1x24xf32>
    %145 = arith.subf %143, %144 : vector<2x1x24xf32>
    %146 = arith.mulf %145, %145 : vector<2x1x24xf32>
    %cst_121 = arith.constant dense<0.000000e+00> : vector<1x24xf32>
    %147 = vector.multi_reduction <add>, %146, %cst_121 [0] : vector<2x1x24xf32> to vector<1x24xf32>
    %148 = vector.shape_cast %147 : vector<1x24xf32> to vector<1x1x24xf32>
    %cst_122 = arith.constant dense<0.000000e+00> : vector<1xf32>
    %149 = vector.multi_reduction <add>, %148, %cst_122 [1, 2] : vector<1x1x24xf32> to vector<1xf32>
    %150 = vector.shape_cast %149 : vector<1xf32> to vector<1x1x1xf32>
    %151 = vector.extract %150[0, 0, 0] : f32 from vector<1x1x1xf32>
    %cst_123 = arith.constant 0.020833334 : f32
    %152 = arith.mulf %151, %cst_123 : f32
    %cst_124 = arith.constant 0.000000e+00 : f32
    %153 = arith.addf %cst_124, %152 : f32
    %c0_125 = arith.constant 0 : index
    %c0_126 = arith.constant 0 : index
    %c0_127 = arith.constant 0 : index
    %154 = vector.load %arg27[%c0_125, %c0_126, %c0_127] : memref<2x1x18xf32, #tpu.memory_space<vmem>>, vector<2x1x18xf32>
    %cst_128 = arith.constant 1.000000e+00 : f32
    %155 = vector.broadcast %cst_128 : f32 to vector<2x1x18xf32>
    %156 = arith.subf %154, %155 : vector<2x1x18xf32>
    %157 = arith.mulf %156, %156 : vector<2x1x18xf32>
    %cst_129 = arith.constant dense<0.000000e+00> : vector<1x18xf32>
    %158 = vector.multi_reduction <add>, %157, %cst_129 [0] : vector<2x1x18xf32> to vector<1x18xf32>
    %159 = vector.shape_cast %158 : vector<1x18xf32> to vector<1x1x18xf32>
    %cst_130 = arith.constant dense<0.000000e+00> : vector<1xf32>
    %160 = vector.multi_reduction <add>, %159, %cst_130 [1, 2] : vector<1x1x18xf32> to vector<1xf32>
    %161 = vector.shape_cast %160 : vector<1xf32> to vector<1x1x1xf32>
    %162 = vector.extract %161[0, 0, 0] : f32 from vector<1x1x1xf32>
    %cst_131 = arith.constant 0.027777778 : f32
    %163 = arith.mulf %162, %cst_131 : f32
    %164 = arith.addf %153, %163 : f32
    %c0_132 = arith.constant 0 : index
    %c0_133 = arith.constant 0 : index
    %c0_134 = arith.constant 0 : index
    %165 = vector.load %arg28[%c0_132, %c0_133, %c0_134] : memref<2x1x32xf32, #tpu.memory_space<vmem>>, vector<2x1x32xf32>
    %cst_135 = arith.constant 1.000000e+00 : f32
    %166 = vector.broadcast %cst_135 : f32 to vector<2x1x32xf32>
    %167 = arith.subf %165, %166 : vector<2x1x32xf32>
    %168 = arith.mulf %167, %167 : vector<2x1x32xf32>
    %cst_136 = arith.constant dense<0.000000e+00> : vector<1x32xf32>
    %169 = vector.multi_reduction <add>, %168, %cst_136 [0] : vector<2x1x32xf32> to vector<1x32xf32>
    %170 = vector.shape_cast %169 : vector<1x32xf32> to vector<1x1x32xf32>
    %cst_137 = arith.constant dense<0.000000e+00> : vector<1xf32>
    %171 = vector.multi_reduction <add>, %170, %cst_137 [1, 2] : vector<1x1x32xf32> to vector<1xf32>
    %172 = vector.shape_cast %171 : vector<1xf32> to vector<1x1x1xf32>
    %173 = vector.extract %172[0, 0, 0] : f32 from vector<1x1x1xf32>
    %cst_138 = arith.constant 1.562500e-02 : f32
    %174 = arith.mulf %173, %cst_138 : f32
    %175 = arith.addf %164, %174 : f32
    %c0_139 = arith.constant 0 : index
    %c0_140 = arith.constant 0 : index
    %c0_141 = arith.constant 0 : index
    %176 = vector.load %arg29[%c0_139, %c0_140, %c0_141] : memref<2x1x16xf32, #tpu.memory_space<vmem>>, vector<2x1x16xf32>
    %cst_142 = arith.constant 1.000000e+00 : f32
    %177 = vector.broadcast %cst_142 : f32 to vector<2x1x16xf32>
    %178 = arith.subf %176, %177 : vector<2x1x16xf32>
    %179 = arith.mulf %178, %178 : vector<2x1x16xf32>
    %cst_143 = arith.constant dense<0.000000e+00> : vector<1x16xf32>
    %180 = vector.multi_reduction <add>, %179, %cst_143 [0] : vector<2x1x16xf32> to vector<1x16xf32>
    %181 = vector.shape_cast %180 : vector<1x16xf32> to vector<1x1x16xf32>
    %cst_144 = arith.constant dense<0.000000e+00> : vector<1xf32>
    %182 = vector.multi_reduction <add>, %181, %cst_144 [1, 2] : vector<1x1x16xf32> to vector<1xf32>
    %183 = vector.shape_cast %182 : vector<1xf32> to vector<1x1x1xf32>
    %184 = vector.extract %183[0, 0, 0] : f32 from vector<1x1x1xf32>
    %cst_145 = arith.constant 3.125000e-02 : f32
    %185 = arith.mulf %184, %cst_145 : f32
    %186 = arith.addf %175, %185 : f32
    %c0_146 = arith.constant 0 : index
    %c0_147 = arith.constant 0 : index
    %187 = memref.load %arg30[%c0_146, %c0_147] : memref<1x3xf32, #tpu.memory_space<smem>>
    memref.store %10, %arg30[%c0_146, %c0_147] : memref<1x3xf32, #tpu.memory_space<smem>>
    %c0_148 = arith.constant 0 : index
    %c1 = arith.constant 1 : index
    %188 = memref.load %arg30[%c0_148, %c1] : memref<1x3xf32, #tpu.memory_space<smem>>
    memref.store %142, %arg30[%c0_148, %c1] : memref<1x3xf32, #tpu.memory_space<smem>>
    %c0_149 = arith.constant 0 : index
    %c2 = arith.constant 2 : index
    %189 = memref.load %arg30[%c0_149, %c2] : memref<1x3xf32, #tpu.memory_space<smem>>
    memref.store %186, %arg30[%c0_149, %c2] : memref<1x3xf32, #tpu.memory_space<smem>>
    return
  }
}

</mosaic_0001>

<bundles_post_ra>
// kernel: tpu_custom_call.1
= control target key start
LH: loop header
LB: loop body
LE: loop exit
PB: predicated region body
PF: predicated region fallthrough
CT: control target
= control target key end

     0   :  { %s1380_s6 = smov 1   ;;  %s1381_s10 = smov 2   ;;  %s2127_s0 = inlined_call_operand.smem [shape: u32[31], index: -1, kind: input, shape index: {}] }
   0x1   :  { %s1419_s5 = sld [smem:[%s2127_s0]]   ;;  %s1382_s14 = smov 3  }
   0x2   :  { %s1424_s9 = sld [smem:[%s2127_s0 + %s1380_s6]]   ;;  %s1383_s18 = smov 4  }
   0x3   :  { %s1429_s13 = sld [smem:[%s2127_s0 + %s1381_s10]]   ;;  %s1384_s22 = smov 5  }
   0x4   :  { %s1434_s17 = sld [smem:[%s2127_s0 + %s1382_s14]]   ;;  %s1385_s26 = smov 6  }
   0x5   :  { %s1439_s21 = sld [smem:[%s2127_s0 + %s1383_s18]]   ;;  %s1386_s30 = smov 7  }
   0x6   :  { %s1444_s25 = sld [smem:[%s2127_s0 + %s1384_s22]]   ;;  %s1387_s4 = smov 8  }
   0x7   :  { %s1449_s29 = sld [smem:[%s2127_s0 + %s1385_s26]]   ;;  %s1388_s10 = smov 9  }
   0x8   :  { %s1454_s3 = sld [smem:[%s2127_s0 + %s1386_s30]]   ;;  %s1389_s15 = smov 10  }
   0x9   :  { %s1459_s8 = sld [smem:[%s2127_s0 + %s1387_s4]]   ;;  %s1390_s20 = smov 11  }
   0xa   :  { %s1464_s14 = sld [smem:[%s2127_s0 + %s1388_s10]]   ;;  %s1391_s26 = smov 12  }
   0xb   :  { %s1469_s19 = sld [smem:[%s2127_s0 + %s1389_s15]]   ;;  %s1392_s1 = smov 13  }
   0xc   :  { %s1474_s24 = sld [smem:[%s2127_s0 + %s1390_s20]]   ;;  %s1393_s7 = smov 14  }
   0xd   :  { %2141 = sst [smem:[#allocation5_spill]] %s1449_s29  ;;  %s1394_s15 = smov 15  }
   0xe   :  { %2142 = sst [smem:[#allocation6_spill]] %s1454_s3  ;;  %s1395_s22 = smov 16  }
   0xf   :  { %s1479_s30 = sld [smem:[%s2127_s0 + %s1391_s26]]   ;;  %s1396_s28 = smov 17  }
  0x10   :  { %s1484_s6 = sld [smem:[%s2127_s0 + %s1392_s1]]  }
  0x11   :  { %s1489_s12 = sld [smem:[%s2127_s0 + %s1393_s7]]   ;;  %s1397_s7 = smov 18  }
  0x12   :  { %s1494_s20 = sld [smem:[%s2127_s0 + %s1394_s15]]   ;;  %s1398_s15 = smov 19  }
  0x13   :  { %s1499_s27 = sld [smem:[%s2127_s0 + %s1395_s22]]   ;;  %s1399_s22 = smov 20  }
  0x14   :  { %s1504_s4 = sld [smem:[%s2127_s0 + %s1396_s28]]   ;;  %s1400_s28 = smov 21  }
  0x15   :  { %2143 = sst [smem:[#allocation7_spill]] %s1479_s30 }
  0x16   :  { %2144 = sst [smem:[#allocation8_spill]] %s1484_s6 }
  0x17   :  { %s1509_s6 = sld [smem:[%s2127_s0 + %s1397_s7]]   ;;  %s1401_s7 = smov 22  }
  0x18   :  { %s1514_s30 = sld [smem:[%s2127_s0 + %s1398_s15]]   ;;  %s1402_s15 = smov 23  }
  0x19   :  { %s1519_s3 = sld [smem:[%s2127_s0 + %s1399_s22]]   ;;  %s1403_s22 = smov 24  }
  0x1a   :  { %s1524_s29 = sld [smem:[%s2127_s0 + %s1400_s28]]   ;;  %s1404_s28 = smov 25  }
  0x1d   :  { %2145 = sst [smem:[#allocation9_spill]] %s1509_s6 }
  0x1e   :  { %2146 = sst [smem:[#allocation10_spill]] %s1514_s30 }
  0x1f   :  { %2147 = sst [smem:[#allocation11_spill]] %s1519_s3 }
  0x20   :  { %2148 = sst [smem:[#allocation12_spill]] %s1524_s29 }
  0x21   :  { %s1529_s6 = sld [smem:[%s2127_s0 + %s1401_s7]]   ;;  %s1405_s7 = smov 26  }
  0x22   :  { %s1534_s30 = sld [smem:[%s2127_s0 + %s1402_s15]]   ;;  %s1406_s15 = smov 27  }
  0x23   :  { %s1539_s3 = sld [smem:[%s2127_s0 + %s1403_s22]]   ;;  %s1407_s22 = smov 28  }
  0x24   :  { %s1544_s29 = sld [smem:[%s2127_s0 + %s1404_s28]]   ;;  %s1408_s28 = smov 29  }
  0x27   :  { %2149 = sst [smem:[#allocation13_spill]] %s1529_s6 }
  0x28   :  { %2150 = sst [smem:[#allocation14_spill]] %s1534_s30 }
  0x29   :  { %2151 = sst [smem:[#allocation15_spill]] %s1539_s3 }
  0x2a   :  { %2152 = sst [smem:[#allocation16_spill]] %s1544_s29 }
  0x2b   :  { %s1549_s6 = sld [smem:[%s2127_s0 + %s1405_s7]]   ;;  %s1409_s7 = smov 30  }
  0x2c   :  { %s1554_s30 = sld [smem:[%s2127_s0 + %s1406_s15]]  }
  0x2d   :  { %s1559_s3 = sld [smem:[%s2127_s0 + %s1407_s22]]  }
  0x2e   :  { %s1564_s29 = sld [smem:[%s2127_s0 + %s1408_s28]]  }
  0x31   :  { %2153 = sst [smem:[#allocation17_spill]] %s1549_s6 }
  0x32   :  { %s1569_s6 = sld [smem:[%s2127_s0 + %s1409_s7]]  }
  0x33   :  { %v127_v0 = vld [vmem:[%s1419_s5] sm:$0xff]  ;;  %v128_v1 = vld [vmem:[%s1419_s5 + $0x8] sm:$0xff]  ;;  %vm135_vm0 = vcmask 261120   ;;  %vm999_vm1 = vcmask 519168   ;;  %v262_v37 = vld [vmem:[%s1439_s21 + $0x10] sm:$0xff]  ;;  %vm215_vm2 = vcmask 64512  }
  0x34   :  { %v129_v2 = vld [vmem:[%s1424_s9] sm:$0xff]  ;;  %v130_v3 = vld [vmem:[%s1424_s9 + $0x8] sm:$0xff]  ;;  %v278_v41 = vld [vmem:[%s1444_s25 + $0x10] sm:$0xff]  ;;  %vm743_vm3 = vcmask 62464   ;;  %vm495_vm4 = vcmask 60416   ;;  %s2154_s0 = sld [smem:[#allocation11_spill]] }
  0x35   :  { %v131_v4 = vsub.f32 %v127_v0, %v129_v2  ;;  %v991_v5 = vld [vmem:[%s1489_s12] sm:$0xf]  ;;  %v992_v6 = vld [vmem:[%s1489_s12 + $0x4] sm:$0xf]  ;;  %v132_v7 = vsub.f32 %v128_v1, %v130_v3  ;;  %v1016_v14 = vld [vmem:[%s1499_s27 + $0x8] sm:$0xff]  ;;  %v294_v48 = vsub.f32 %v262_v37, %v278_v41  ;;  %s2155_s5 = sld [smem:[#allocation12_spill]] }
  0x36   :  { %v993_v8 = vld [vmem:[%s1494_s20] sm:$0xf]  ;;  %v994_v9 = vld [vmem:[%s1494_s20 + $0x4] sm:$0xf]  ;;  %v1018_v16 = vld [vmem:[%s1504_s4 + $0x8] sm:$0xff]  ;;  %vm1083_vm5 = vcmask 388096  }
  0x37   :  { %v1015_v10 = vld [vmem:[%s1499_s27] sm:$0xff]  ;;  %v133_v11 = vand.u32 2147483647, %v131_v4  ;;  %v995_v12 = vsub.f32 %v991_v5, %v993_v8  ;;  %v996_v13 = vsub.f32 %v992_v6, %v994_v9  ;;  %v134_v17 = vand.u32 2147483647, %v132_v7  ;;  %v261_v36 = vld [vmem:[%s1439_s21 + $0x8] sm:$0xff] }
  0x38   :  { %v1017_v15 = vld [vmem:[%s1504_s4] sm:$0xff]  ;;  %v1020_v19 = vsub.f32 %v1016_v14, %v1018_v16  ;;  %v277_v40 = vld [vmem:[%s1444_s25 + $0x8] sm:$0xff]  ;;  %v263_v42 = vld [vmem:[%s1439_s21 + $0x18] sm:$0xff]  ;;  %v310_v5 = vand.u32 2147483647, %v294_v48  ;;  %s2156_s9 = sld [smem:[#allocation5_spill]] }
  0x39   :  { %v1019_v18 = vsub.f32 %v1015_v10, %v1017_v15  ;;  %v136_v20 = vsel %vm135_vm0, %v133_v11, 0.0  ;;  %v997_v21 = vand.u32 2147483647, %v995_v12  ;;  %v998_v22 = vand.u32 2147483647, %v996_v13  ;;  %v260_v34 = vld [vmem:[%s1439_s21] sm:$0xff] }
  0x3a   :  { %v137_v23 = vsel %vm135_vm0, %v134_v17, 0.0  ;;  %v1022_v25 = vand.u32 2147483647, %v1020_v19  ;;  %v276_v38 = vld [vmem:[%s1444_s25] sm:$0xff]  ;;  %v279_v43 = vld [vmem:[%s1444_s25 + $0x18] sm:$0xff]  ;;  %v265_v46 = vld [vmem:[%s1439_s21 + $0x28] sm:$0xff]  ;;  %v293_v47 = vsub.f32 %v261_v36, %v277_v40 }
  0x3b   :  { %v1021_v24 = vand.u32 2147483647, %v1019_v18  ;;  %v138_v26 = vadd.f32 %v137_v23, %v136_v20  ;;  %v1000_v27 = vsel %vm999_vm1, %v997_v21, 0.0  ;;  %v1001_v28 = vsel %vm999_vm1, %v998_v22, 0.0  ;;  %v264_v45 = vld [vmem:[%s1439_s21 + $0x20] sm:$0xff]  ;;  %v266_v49 = vld [vmem:[%s1439_s21 + $0x30] sm:$0xff] }
  0x3c   :  { %v1002_v29 = vadd.f32 %v1001_v28, %v1000_v27  ;;  %v1024_v31 = vsel %vm135_vm0, %v1022_v25, 0.0  ;;  %v292_v44 = vsub.f32 %v260_v34, %v276_v38  ;;  %v267_v50 = vld [vmem:[%s1439_s21 + $0x38] sm:$0xff]  ;;  %v268_v51 = vld [vmem:[%s1439_s21 + $0x40] sm:$0xff]  ;;  %v269_v53 = vld [vmem:[%s1439_s21 + $0x48] sm:$0xff]  ;;  %v295_v60 = vsub.f32 %v263_v42, %v279_v43 }
  0x3d   :  { %v1023_v30 = vsel %vm135_vm0, %v1021_v24, 0.0  ;;  %v139_v32 = vsel %vm135_vm0, %v138_v26, 0.0  ;;  %v280_v52 = vld [vmem:[%s1444_s25 + $0x20] sm:$0xff]  ;;  %v270_v54 = vld [vmem:[%s1439_s21 + $0x50] sm:$0xff]  ;;  %v271_v55 = vld [vmem:[%s1439_s21 + $0x58] sm:$0xff]  ;;  %v327_v24 = vsel %vm215_vm2, %v310_v5, 0.0 }
  0x3e   :  { %v1025_v33 = vadd.f32 %v1024_v31, %v1023_v30  ;;  %140 = vadd.xlane.f32.xlu0 %v139_v32  ;;  %v1003_v35 = vsel %vm999_vm1, %v1002_v29, 0.0  ;;  %v272_v56 = vld [vmem:[%s1439_s21 + $0x60] sm:$0xff]  ;;  %v281_v57 = vld [vmem:[%s1444_s25 + $0x28] sm:$0xff]  ;;  %v282_v58 = vld [vmem:[%s1444_s25 + $0x30] sm:$0xff]  ;;  %v308_v0 = vand.u32 2147483647, %v292_v44  ;;  %v296_v3 = vsub.f32 %v264_v45, %v280_v52 }
  0x3f   :  { %1004 = vadd.xlane.f32.xlu1 %v1003_v35  ;;  %v283_v59 = vld [vmem:[%s1444_s25 + $0x38] sm:$0xff]  ;;  %v284_v61 = vld [vmem:[%s1444_s25 + $0x40] sm:$0xff]  ;;  %v285_v62 = vld [vmem:[%s1444_s25 + $0x48] sm:$0xff]  ;;  %v309_v4 = vand.u32 2147483647, %v293_v47  ;;  %v297_v7 = vsub.f32 %v265_v46, %v281_v57  ;;  %v298_v11 = vsub.f32 %v266_v49, %v282_v58  ;;  %vm915_vm6 = vcmask 59392  }
  0x40   :  { %v1026_v39 = vsel %vm135_vm0, %v1025_v33, 0.0  ;;  %v286_v63 = vld [vmem:[%s1444_s25 + $0x50] sm:$0xff]  ;;  %v287_v1 = vld [vmem:[%s1444_s25 + $0x58] sm:$0xff]  ;;  %v288_v2 = vld [vmem:[%s1444_s25 + $0x60] sm:$0xff]  ;;  %v299_v12 = vsub.f32 %v267_v50, %v283_v59  ;;  %v300_v13 = vsub.f32 %v268_v51, %v284_v61  ;;  %v311_v14 = vand.u32 2147483647, %v295_v60 }
  0x41   :  { %v273_v6 = vld [vmem:[%s1439_s21 + $0x68] sm:$0xff]  ;;  %v274_v8 = vld [vmem:[%s1439_s21 + $0x70] sm:$0xff]  ;;  %v275_v15 = vld [vmem:[%s1439_s21 + $0x78] sm:$0xff]  ;;  %v301_v17 = vsub.f32 %v269_v53, %v285_v62  ;;  %v302_v18 = vsub.f32 %v270_v54, %v286_v63  ;;  %v303_v19 = vsub.f32 %v271_v55, %v287_v1  ;;  %v304_v20 = vsub.f32 %v272_v56, %v288_v2  ;;  %s2159_s21 = sld [smem:[#allocation8_spill]] }
  0x42   :  { %1027 = vadd.xlane.f32.xlu0 %v1026_v39  ;;  %v289_v9 = vld [vmem:[%s1444_s25 + $0x68] sm:$0xff]  ;;  %v290_v10 = vld [vmem:[%s1444_s25 + $0x70] sm:$0xff]  ;;  %v291_v16 = vld [vmem:[%s1444_s25 + $0x78] sm:$0xff]  ;;  %v312_v21 = vand.u32 2147483647, %v296_v3  ;;  %v324_v22 = vsel %vm215_vm2, %v308_v0, 0.0 }
  0x43   :  { %v325_v23 = vsel %vm215_vm2, %v309_v4, 0.0  ;;  %v305_v25 = vsub.f32 %v273_v6, %v289_v9  ;;  %v306_v26 = vsub.f32 %v274_v8, %v290_v10  ;;  %v313_v27 = vand.u32 2147483647, %v297_v7  ;;  %v151_v33 = vld [vmem:[%s1429_s13] sm:$0xff]  ;;  %v153_v41 = vld [vmem:[%s1429_s13 + $0x10] sm:$0xff]  ;;  %v152_v44 = vld [vmem:[%s1429_s13 + $0x8] sm:$0xff] }
  0x44   :  { %v326_v28 = vadd.f32 %v325_v23, %v324_v22  ;;  %v307_v29 = vsub.f32 %v275_v15, %v291_v16  ;;  %v314_v30 = vand.u32 2147483647, %v298_v11  ;;  %v315_v31 = vand.u32 2147483647, %v299_v12  ;;  %v154_v45 = vld [vmem:[%s1429_s13 + $0x18] sm:$0xff]  ;;  %v155_v46 = vld [vmem:[%s1429_s13 + $0x20] sm:$0xff] }
  0x45   :  { %v329_v32 = vsel %vm215_vm2, %v311_v14, 0.0  ;;  %v316_v34 = vand.u32 2147483647, %v300_v13  ;;  %v317_v35 = vand.u32 2147483647, %v301_v17  ;;  %v331_v40 = vsel %vm215_vm2, %v312_v21, 0.0 }
  0x46   :  { %v318_v36 = vand.u32 2147483647, %v302_v18  ;;  %v328_v37 = vadd.f32 %v327_v24, %v326_v28  ;;  %v319_v38 = vand.u32 2147483647, %v303_v19  ;;  %v320_v39 = vand.u32 2147483647, %v304_v20 }
  0x47   :  { %v1631_v42 = vand.u32 2147483647, %v305_v25  ;;  %v167_v47 = vld [vmem:[%s1434_s17] sm:$0xff]  ;;  %v169_v48 = vld [vmem:[%s1434_s17 + $0x10] sm:$0xff]  ;;  %v1638_v49 = vand.u32 2147483647, %v306_v26 }
  0x48   :  { %v330_v43 = vadd.f32 %v329_v32, %v328_v37  ;;  %v333_v50 = vsel %vm215_vm2, %v313_v27, 0.0  ;;  %v156_v51 = vld [vmem:[%s1429_s13 + $0x28] sm:$0xff]  ;;  %v157_v52 = vld [vmem:[%s1429_s13 + $0x30] sm:$0xff]  ;;  %v158_v53 = vld [vmem:[%s1429_s13 + $0x38] sm:$0xff]  ;;  %v1645_v55 = vand.u32 2147483647, %v307_v29  ;;  %v183_v63 = vsub.f32 %v151_v33, %v167_v47 }
  0x49   :  { %v171_v54 = vld [vmem:[%s1434_s17 + $0x20] sm:$0xff]  ;;  %v335_v57 = vsel %vm215_vm2, %v314_v30, 0.0  ;;  %v160_v59 = vld [vmem:[%s1429_s13 + $0x48] sm:$0xff]  ;;  %v170_v61 = vld [vmem:[%s1434_s17 + $0x18] sm:$0xff]  ;;  %v337_v0 = vsel %vm215_vm2, %v315_v31, 0.0  ;;  %v339_v1 = vsel %vm215_vm2, %v316_v34, 0.0  ;;  %v185_v6 = vsub.f32 %v153_v41, %v169_v48 }
  0x4a   :  { %v332_v56 = vadd.f32 %v331_v40, %v330_v43  ;;  %v159_v58 = vld [vmem:[%s1429_s13 + $0x40] sm:$0xff]  ;;  %v168_v60 = vld [vmem:[%s1434_s17 + $0x8] sm:$0xff]  ;;  %v173_v62 = vld [vmem:[%s1434_s17 + $0x30] sm:$0xff]  ;;  %v187_v7 = vsub.f32 %v155_v46, %v171_v54  ;;  %v341_v9 = vsel %vm215_vm2, %v317_v35, 0.0  ;;  %v343_v10 = vsel %vm215_vm2, %v318_v36, 0.0  ;;  %s2160_s25 = sld [smem:[#allocation9_spill]] }
  0x4b   :  { %v161_v2 = vld [vmem:[%s1429_s13 + $0x50] sm:$0xff]  ;;  %v162_v3 = vld [vmem:[%s1429_s13 + $0x58] sm:$0xff]  ;;  %v172_v4 = vld [vmem:[%s1434_s17 + $0x28] sm:$0xff]  ;;  %v345_v11 = vsel %vm215_vm2, %v319_v38, 0.0  ;;  %v347_v15 = vsel %vm215_vm2, %v320_v39, 0.0  ;;  %v184_v19 = vsub.f32 %v152_v44, %v168_v60  ;;  %v186_v20 = vsub.f32 %v154_v45, %v170_v61 }
  0x4c   :  { %v174_v5 = vld [vmem:[%s1434_s17 + $0x38] sm:$0xff]  ;;  %v334_v8 = vadd.f32 %v333_v50, %v332_v56  ;;  %v163_v12 = vld [vmem:[%s1429_s13 + $0x60] sm:$0xff]  ;;  %v176_v14 = vld [vmem:[%s1434_s17 + $0x48] sm:$0xff]  ;;  %v189_v21 = vsub.f32 %v157_v52, %v173_v62  ;;  %v188_v25 = vsub.f32 %v156_v51, %v172_v4  ;;  %v199_v27 = vand.u32 2147483647, %v183_v63 }
  0x4d   :  { %v175_v13 = vld [vmem:[%s1434_s17 + $0x40] sm:$0xff]  ;;  %v177_v16 = vld [vmem:[%s1434_s17 + $0x50] sm:$0xff]  ;;  %v178_v17 = vld [vmem:[%s1434_s17 + $0x58] sm:$0xff]  ;;  %v190_v26 = vsub.f32 %v158_v53, %v174_v5  ;;  %v192_v31 = vsub.f32 %v160_v59, %v176_v14  ;;  %v201_v32 = vand.u32 2147483647, %v185_v6 }
  0x4e   :  { %v179_v18 = vld [vmem:[%s1434_s17 + $0x60] sm:$0xff]  ;;  %v336_v22 = vadd.f32 %v335_v57, %v334_v8  ;;  %v164_v23 = vld [vmem:[%s1429_s13 + $0x68] sm:$0xff]  ;;  %v165_v28 = vld [vmem:[%s1429_s13 + $0x70] sm:$0xff]  ;;  %v191_v30 = vsub.f32 %v159_v58, %v175_v13  ;;  %v203_v33 = vand.u32 2147483647, %v187_v7  ;;  %v193_v37 = vsub.f32 %v161_v2, %v177_v16 }
  0x4f   :  { %v180_v24 = vld [vmem:[%s1434_s17 + $0x68] sm:$0xff]  ;;  %v181_v29 = vld [vmem:[%s1434_s17 + $0x70] sm:$0xff]  ;;  %v166_v35 = vld [vmem:[%s1429_s13 + $0x78] sm:$0xff]  ;;  %v194_v38 = vsub.f32 %v162_v3, %v178_v17  ;;  %v195_v39 = vsub.f32 %v163_v12, %v179_v18  ;;  %v200_v41 = vand.u32 2147483647, %v184_v19  ;;  %v216_v51 = vsel %vm215_vm2, %v199_v27, 0.0 }
  0x50   :  { %v338_v34 = vadd.f32 %v337_v0, %v336_v22  ;;  %v182_v36 = vld [vmem:[%s1434_s17 + $0x78] sm:$0xff]  ;;  %v196_v40 = vsub.f32 %v164_v23, %v180_v24  ;;  %v202_v43 = vand.u32 2147483647, %v186_v20  ;;  %v205_v44 = vand.u32 2147483647, %v189_v21  ;;  %s2157_s13 = sld [smem:[#allocation6_spill]] }
  0x51   :  { %v197_v46 = vsub.f32 %v165_v28, %v181_v29  ;;  %v204_v47 = vand.u32 2147483647, %v188_v25  ;;  %v206_v48 = vand.u32 2147483647, %v190_v26  ;;  %v207_v50 = vand.u32 2147483647, %v191_v30 }
  0x52   :  { %v340_v45 = vadd.f32 %v339_v1, %v338_v34  ;;  %v217_v52 = vsel %vm215_vm2, %v201_v32, 0.0  ;;  %v219_v53 = vsel %vm215_vm2, %v203_v33, 0.0  ;;  %v198_v56 = vsub.f32 %v166_v35, %v182_v36  ;;  %v679_v20 = vld [vmem:[%s1469_s19] sm:$0x3f]  ;;  %v680_v26 = vld [vmem:[%s1469_s19 + $0x8] sm:$0x3f] }
  0x53   :  { %v208_v57 = vand.u32 2147483647, %v192_v31  ;;  %v218_v58 = vadd.f32 %v217_v52, %v216_v51  ;;  %v209_v59 = vand.u32 2147483647, %v193_v37  ;;  %v221_v60 = vsel %vm215_vm2, %v205_v44, 0.0  ;;  %s2158_s17 = sld [smem:[#allocation7_spill]] }
  0x54   :  { %v342_v54 = vadd.f32 %v341_v9, %v340_v45  ;;  %v231_v61 = vsel %vm215_vm2, %v200_v41, 0.0  ;;  %v232_v62 = vsel %vm215_vm2, %v202_v43, 0.0  ;;  %v234_v2 = vsel %vm215_vm2, %v204_v47, 0.0  ;;  %v695_v23 = vld [vmem:[%s1474_s24] sm:$0x3f] }
  0x55   :  { %v220_v0 = vadd.f32 %v219_v53, %v218_v58  ;;  %v233_v1 = vadd.f32 %v232_v62, %v231_v61  ;;  %v210_v3 = vand.u32 2147483647, %v194_v38  ;;  %v211_v4 = vand.u32 2147483647, %v195_v39  ;;  %v696_v27 = vld [vmem:[%s1474_s24 + $0x8] sm:$0x3f] }
  0x56   :  { %v344_v63 = vadd.f32 %v343_v10, %v342_v54  ;;  %v223_v5 = vsel %vm215_vm2, %v207_v50, 0.0  ;;  %v236_v6 = vsel %vm215_vm2, %v206_v48, 0.0  ;;  %v349_v8 = vsel %vm215_vm2, %v1631_v42, 0.0  ;;  %v681_v30 = vld [vmem:[%s1469_s19 + $0x10] sm:$0x3f] }
  0x57   :  { %v222_v9 = vadd.f32 %v221_v60, %v220_v0  ;;  %v235_v12 = vadd.f32 %v234_v2, %v233_v1  ;;  %v212_v13 = vand.u32 2147483647, %v196_v40  ;;  %v213_v10 = vand.u32 2147483647, %v197_v46  ;;  %v697_v31 = vld [vmem:[%s1474_s24 + $0x10] sm:$0x3f] }
  0x58   :  { %v346_v7 = vadd.f32 %v345_v11, %v344_v63  ;;  %v225_v14 = vsel %vm215_vm2, %v209_v59, 0.0  ;;  %v238_v16 = vsel %vm215_vm2, %v208_v57, 0.0  ;;  %v351_v18 = vsel %vm215_vm2, %v1638_v49, 0.0  ;;  %v683_v35 = vld [vmem:[%s1469_s19 + $0x20] sm:$0x3f] }
  0x59   :  { %v224_v11 = vadd.f32 %v223_v5, %v222_v9  ;;  %v237_v19 = vadd.f32 %v236_v6, %v235_v12  ;;  %v214_v42 = vand.u32 2147483647, %v198_v56  ;;  %v227_v21 = vsel %vm215_vm2, %v211_v4, 0.0  ;;  %v698_v36 = vld [vmem:[%s1474_s24 + $0x18] sm:$0x3f] }
  0x5a   :  { %v348_v17 = vadd.f32 %v347_v15, %v346_v7  ;;  %v240_v22 = vsel %vm215_vm2, %v210_v3, 0.0  ;;  %v353_v15 = vsel %vm215_vm2, %v1645_v55, 0.0  ;;  %v229_v28 = vsel %vm215_vm2, %v213_v10, 0.0  ;;  %v682_v55 = vld [vmem:[%s1469_s19 + $0x18] sm:$0x3f] }
  0x5b   :  { %v226_v25 = vadd.f32 %v225_v14, %v224_v11  ;;  %v239_v49 = vadd.f32 %v238_v16, %v237_v19  ;;  %v242_v29 = vsel %vm215_vm2, %v212_v13, 0.0  ;;  %v711_v37 = vsub.f32 %v679_v20, %v695_v23  ;;  %v684_v39 = vld [vmem:[%s1469_s19 + $0x28] sm:$0x3f]  ;;  %v699_v40 = vld [vmem:[%s1474_s24 + $0x20] sm:$0x3f] }
  0x5c   :  { %v350_v24 = vadd.f32 %v349_v8, %v348_v17  ;;  %v244_v38 = vsel %vm215_vm2, %v214_v42, 0.0  ;;  %v712_v41 = vsub.f32 %v680_v26, %v696_v27  ;;  %v685_v46 = vld [vmem:[%s1469_s19 + $0x30] sm:$0x3f]  ;;  %v686_v47 = vld [vmem:[%s1469_s19 + $0x38] sm:$0x3f]  ;;  %v713_v53 = vsub.f32 %v681_v30, %v697_v31 }
  0x5d   :  { %v228_v33 = vadd.f32 %v227_v21, %v226_v25  ;;  %v241_v34 = vadd.f32 %v240_v22, %v239_v49  ;;  %v687_v48 = vld [vmem:[%s1469_s19 + $0x40] sm:$0x3f]  ;;  %v700_v50 = vld [vmem:[%s1474_s24 + $0x28] sm:$0x3f]  ;;  %v701_v51 = vld [vmem:[%s1474_s24 + $0x30] sm:$0x3f]  ;;  %v714_v60 = vsub.f32 %v682_v55, %v698_v36  ;;  %v715_v9 = vsub.f32 %v683_v35, %v699_v40 }
  0x5e   :  { %v352_v32 = vadd.f32 %v351_v18, %v350_v24  ;;  %v702_v52 = vld [vmem:[%s1474_s24 + $0x38] sm:$0x3f]  ;;  %v688_v54 = vld [vmem:[%s1469_s19 + $0x48] sm:$0x3f]  ;;  %v689_v56 = vld [vmem:[%s1469_s19 + $0x50] sm:$0x3f]  ;;  %v716_v13 = vsub.f32 %v684_v39, %v700_v50  ;;  %v717_v11 = vsub.f32 %v685_v46, %v701_v51 }
  0x5f   :  { %v230_v44 = vadd.f32 %v229_v28, %v228_v33  ;;  %v243_v45 = vadd.f32 %v242_v29, %v241_v34  ;;  %v703_v57 = vld [vmem:[%s1474_s24 + $0x40] sm:$0x3f]  ;;  %v704_v58 = vld [vmem:[%s1474_s24 + $0x48] sm:$0x3f]  ;;  %v705_v59 = vld [vmem:[%s1474_s24 + $0x50] sm:$0x3f]  ;;  %v718_v19 = vsub.f32 %v686_v47, %v702_v52 }
  0x60   :  { %v354_v43 = vadd.f32 %v353_v15, %v352_v32  ;;  %v690_v0 = vld [vmem:[%s1469_s19 + $0x58] sm:$0x3f]  ;;  %v691_v1 = vld [vmem:[%s1469_s19 + $0x60] sm:$0x3f]  ;;  %v692_v2 = vld [vmem:[%s1469_s19 + $0x68] sm:$0x3f]  ;;  %v719_v20 = vsub.f32 %v687_v48, %v703_v57  ;;  %v720_v42 = vsub.f32 %v688_v54, %v704_v58  ;;  %v721_v21 = vsub.f32 %v689_v56, %v705_v59 }
  0x61   :  { %v245_v62 = vadd.f32 %v244_v38, %v243_v45  ;;  %v246_v63 = vsel %vm215_vm2, %v230_v44, 0.0  ;;  %v693_v3 = vld [vmem:[%s1469_s19 + $0x70] sm:$0x3f]  ;;  %v706_v4 = vld [vmem:[%s1474_s24 + $0x58] sm:$0x3f]  ;;  %v571_v36 = vld [vmem:[%s1459_s8] sm:$0xff] }
  0x62   :  { %v355_v61 = vsel %vm215_vm2, %v354_v43, 0.0  ;;  %v727_v5 = vand.u32 2147483647, %v711_v37  ;;  %v707_v6 = vld [vmem:[%s1474_s24 + $0x60] sm:$0x3f]  ;;  %v722_v24 = vsub.f32 %v690_v0, %v706_v4  ;;  %v573_v37 = vld [vmem:[%s1459_s8 + $0x10] sm:$0xff] }
  0x63   :  { %356 = vadd.xlane.f32.xlu1 %v355_v61  ;;  %v708_v7 = vld [vmem:[%s1474_s24 + $0x68] sm:$0x3f]  ;;  %v709_v8 = vld [vmem:[%s1474_s24 + $0x70] sm:$0x3f]  ;;  %v247_v12 = vsel %vm215_vm2, %v245_v62, 0.0  ;;  %v723_v15 = vsub.f32 %v691_v1, %v707_v6  ;;  %v575_v38 = vld [vmem:[%s1459_s8 + $0x20] sm:$0xff] }
  0x64   :  { %v728_v10 = vand.u32 2147483647, %v712_v41  ;;  %v729_v14 = vand.u32 2147483647, %v713_v53  ;;  %v248_v16 = vadd.f32 %v247_v12, %v246_v63  ;;  %v694_v17 = vld [vmem:[%s1469_s19 + $0x78] sm:$0x3f]  ;;  %v724_v25 = vsub.f32 %v692_v2, %v708_v7 }
  0x65   :  { %v710_v18 = vld [vmem:[%s1474_s24 + $0x78] sm:$0x3f]  ;;  %v730_v22 = vand.u32 2147483647, %v714_v60  ;;  %v744_v23 = vsel %vm743_vm3, %v727_v5, 0.0  ;;  %v725_v49 = vsub.f32 %v693_v3, %v709_v8  ;;  %v577_v47 = vld [vmem:[%s1459_s8 + $0x30] sm:$0xff] }
  0x66   :  { %249 = vadd.xlane.f32.xlu0 %v248_v16  ;;  %v726_v26 = vsub.f32 %v694_v17, %v710_v18  ;;  %v731_v27 = vand.u32 2147483647, %v715_v9  ;;  %v745_v28 = vsel %vm743_vm3, %v728_v10, 0.0  ;;  %v747_v29 = vsel %vm743_vm3, %v729_v14, 0.0  ;;  %v572_v46 = vld [vmem:[%s1459_s8 + $0x8] sm:$0xf] }
  0x67   :  { %v732_v30 = vand.u32 2147483647, %v716_v13  ;;  %v733_v31 = vand.u32 2147483647, %v717_v11  ;;  %v734_v32 = vand.u32 2147483647, %v718_v19  ;;  %v746_v33 = vadd.f32 %v745_v28, %v744_v23 }
  0x68   :  { %v735_v34 = vand.u32 2147483647, %v719_v20  ;;  %v736_v55 = vand.u32 2147483647, %v720_v42  ;;  %v749_v35 = vsel %vm743_vm3, %v730_v22, 0.0  ;;  %v751_v45 = vsel %vm743_vm3, %v731_v27, 0.0 }
  0x69   :  { %v737_v39 = vand.u32 2147483647, %v721_v21  ;;  %v738_v40 = vand.u32 2147483647, %v722_v24  ;;  %v739_v41 = vand.u32 2147483647, %v723_v15  ;;  %v748_v43 = vadd.f32 %v747_v29, %v746_v33 }
  0x6a   :  { %v740_v44 = vand.u32 2147483647, %v724_v25  ;;  %v587_v48 = vld [vmem:[%s1464_s14] sm:$0xff]  ;;  %v589_v50 = vld [vmem:[%s1464_s14 + $0x10] sm:$0xff]  ;;  %v1744_v51 = vand.u32 2147483647, %v725_v49 }
  0x6b   :  { %v1746_v52 = vand.u32 2147483647, %v726_v26  ;;  %v750_v53 = vadd.f32 %v749_v35, %v748_v43  ;;  %v574_v54 = vld [vmem:[%s1459_s8 + $0x18] sm:$0xf]  ;;  %v576_v56 = vld [vmem:[%s1459_s8 + $0x28] sm:$0xf]  ;;  %v603_v8 = vsub.f32 %v571_v36, %v587_v48  ;;  %v605_v9 = vsub.f32 %v573_v37, %v589_v50 }
  0x6c   :  { %v579_v57 = vld [vmem:[%s1459_s8 + $0x40] sm:$0xff]  ;;  %v753_v59 = vsel %vm743_vm3, %v732_v30, 0.0  ;;  %v755_v60 = vsel %vm743_vm3, %v733_v31, 0.0  ;;  %v757_v61 = vsel %vm743_vm3, %v734_v32, 0.0  ;;  %v588_v62 = vld [vmem:[%s1464_s14 + $0x8] sm:$0xf] }
  0x6d   :  { %v591_v58 = vld [vmem:[%s1464_s14 + $0x20] sm:$0xff]  ;;  %v593_v63 = vld [vmem:[%s1464_s14 + $0x30] sm:$0xff]  ;;  %v752_v0 = vadd.f32 %v751_v45, %v750_v53  ;;  %v578_v1 = vld [vmem:[%s1459_s8 + $0x38] sm:$0xf]  ;;  %v759_v13 = vsel %vm743_vm3, %v735_v34, 0.0  ;;  %v761_v10 = vsel %vm743_vm3, %v736_v55, 0.0  ;;  %v604_v22 = vsub.f32 %v572_v46, %v588_v62 }
  0x6e   :  { %v580_v2 = vld [vmem:[%s1459_s8 + $0x48] sm:$0xf]  ;;  %v581_v3 = vld [vmem:[%s1459_s8 + $0x50] sm:$0xff]  ;;  %v1761_v4 = vld [vmem:[%s1459_s8 + $0x58] sm:$0xf]  ;;  %v607_v12 = vsub.f32 %v575_v38, %v591_v58  ;;  %v763_v14 = vsel %vm743_vm3, %v737_v39, 0.0  ;;  %v609_v23 = vsub.f32 %v577_v47, %v593_v63 }
  0x6f   :  { %v590_v5 = vld [vmem:[%s1464_s14 + $0x18] sm:$0xf]  ;;  %v592_v6 = vld [vmem:[%s1464_s14 + $0x28] sm:$0xf]  ;;  %v595_v7 = vld [vmem:[%s1464_s14 + $0x40] sm:$0xff]  ;;  %v1770_v16 = vsel %vm743_vm3, %v738_v40, 0.0  ;;  %v754_v11 = vadd.f32 %v753_v59, %v752_v0 }
  0x70   :  { %v583_v17 = vld [vmem:[%s1459_s8 + $0x60] sm:$0xff]  ;;  %v594_v18 = vld [vmem:[%s1464_s14 + $0x38] sm:$0xf]  ;;  %v1775_v19 = vsel %vm743_vm3, %v739_v41, 0.0  ;;  %v596_v20 = vld [vmem:[%s1464_s14 + $0x48] sm:$0xf]  ;;  %v606_v26 = vsub.f32 %v574_v54, %v590_v5  ;;  %v608_v27 = vsub.f32 %v576_v56, %v592_v6  ;;  %v611_v28 = vsub.f32 %v579_v57, %v595_v7 }
  0x71   :  { %v597_v42 = vld [vmem:[%s1464_s14 + $0x50] sm:$0xff]  ;;  %v598_v21 = vld [vmem:[%s1464_s14 + $0x58] sm:$0xf]  ;;  %v1781_v24 = vsel %vm743_vm3, %v740_v44, 0.0  ;;  %v584_v15 = vld [vmem:[%s1459_s8 + $0x68] sm:$0xf]  ;;  %v756_v29 = vadd.f32 %v755_v60, %v754_v11  ;;  %v610_v33 = vsub.f32 %v578_v1, %v594_v18  ;;  %v612_v34 = vsub.f32 %v580_v2, %v596_v20 }
  0x72   :  { %v599_v25 = vld [vmem:[%s1464_s14 + $0x60] sm:$0xff]  ;;  %v600_v49 = vld [vmem:[%s1464_s14 + $0x68] sm:$0xf]  ;;  %v619_v30 = vand.u32 2147483647, %v603_v8  ;;  %v613_v55 = vsub.f32 %v581_v3, %v597_v42  ;;  %v614_v35 = vsub.f32 %v1761_v4, %v598_v21  ;;  %v585_v37 = vld [vmem:[%s1459_s8 + $0x70] sm:$0xff] }
  0x73   :  { %v621_v31 = vand.u32 2147483647, %v605_v9  ;;  %v623_v32 = vand.u32 2147483647, %v607_v12  ;;  %v758_v36 = vadd.f32 %v757_v61, %v756_v29  ;;  %v601_v38 = vld [vmem:[%s1464_s14 + $0x70] sm:$0xff]  ;;  %v615_v39 = vsub.f32 %v583_v17, %v599_v25 }
  0x74   :  { %v620_v40 = vand.u32 2147483647, %v604_v22  ;;  %v625_v41 = vand.u32 2147483647, %v609_v23  ;;  %v616_v43 = vsub.f32 %v584_v15, %v600_v49  ;;  %v622_v44 = vand.u32 2147483647, %v606_v26 }
  0x75   :  { %v624_v45 = vand.u32 2147483647, %v608_v27  ;;  %v627_v46 = vand.u32 2147483647, %v611_v28  ;;  %v760_v47 = vadd.f32 %v759_v13, %v758_v36  ;;  %v586_v48 = vld [vmem:[%s1459_s8 + $0x78] sm:$0xf]  ;;  %v617_v57 = vsub.f32 %v585_v37, %v601_v38 }
  0x76   :  { %v635_v50 = vsel %vm215_vm2, %v619_v30, 0.0  ;;  %v636_v53 = vsel %vm215_vm2, %v621_v31, 0.0  ;;  %v638_v54 = vsel %vm215_vm2, %v623_v32, 0.0  ;;  %v602_v56 = vld [vmem:[%s1464_s14 + $0x78] sm:$0xf]  ;;  %v640_v63 = vsel %vm215_vm2, %v625_v41, 0.0 }
  0x77   :  { %v626_v58 = vand.u32 2147483647, %v610_v33  ;;  %v628_v59 = vand.u32 2147483647, %v612_v34  ;;  %v637_v60 = vadd.f32 %v636_v53, %v635_v50  ;;  %v762_v61 = vadd.f32 %v761_v10, %v760_v47  ;;  %v1075_v1 = vld [vmem:[%s2154_s0] sm:$0xf] }
  0x78   :  { %v629_v62 = vand.u32 2147483647, %v613_v55  ;;  %v650_v0 = vsel %vm495_vm4, %v620_v40, 0.0  ;;  %v631_v2 = vand.u32 2147483647, %v615_v39  ;;  %v651_v4 = vsel %vm495_vm4, %v622_v44, 0.0 }
  0x79   :  { %v639_v3 = vadd.f32 %v638_v54, %v637_v60  ;;  %v653_v5 = vsel %vm495_vm4, %v624_v45, 0.0  ;;  %v1076_v6 = vld [vmem:[%s2154_s0 + $0x4] sm:$0xf]  ;;  %v764_v7 = vadd.f32 %v763_v14, %v762_v61  ;;  %v618_v8 = vsub.f32 %v586_v48, %v602_v56  ;;  %v1077_v13 = vld [vmem:[%s2155_s5] sm:$0xf]  ;;  %s2161_s8 = sld [smem:[#allocation10_spill]] }
  0x7a   :  { %v642_v9 = vsel %vm215_vm2, %v627_v46, 0.0  ;;  %v652_v12 = vadd.f32 %v651_v4, %v650_v0  ;;  %v1078_v10 = vld [vmem:[%s2155_s5 + $0x4] sm:$0xf]  ;;  %v630_v17 = vand.u32 2147483647, %v614_v35  ;;  %v655_v20 = vsel %vm495_vm4, %v626_v58, 0.0 }
  0x7b   :  { %v632_v18 = vand.u32 2147483647, %v616_v43  ;;  %v641_v11 = vadd.f32 %v640_v63, %v639_v3  ;;  %v766_v42 = vadd.f32 %v1770_v16, %v764_v7  ;;  %v633_v21 = vand.u32 2147483647, %v617_v57  ;;  %v367_v54 = vld [vmem:[%s2156_s9] sm:$0xf] }
  0x7c   :  { %v644_v22 = vsel %vm215_vm2, %v629_v62, 0.0  ;;  %v654_v23 = vadd.f32 %v653_v5, %v652_v12  ;;  %v657_v14 = vsel %vm495_vm4, %v628_v59, 0.0  ;;  %v1079_v25 = vsub.f32 %v1075_v1, %v1077_v13  ;;  %v368_v56 = vld [vmem:[%s2156_s9 + $0x4] sm:$0xf]  ;;  %v369_v57 = vld [vmem:[%s2156_s9 + $0x8] sm:$0xf] }
  0x7d   :  { %v643_v15 = vadd.f32 %v642_v9, %v641_v11  ;;  %v1080_v49 = vsub.f32 %v1076_v6, %v1078_v10  ;;  %v768_v26 = vadd.f32 %v1775_v19, %v766_v42  ;;  %v646_v27 = vsel %vm215_vm2, %v631_v2, 0.0  ;;  %v399_v58 = vld [vmem:[%s2157_s13] sm:$0xf]  ;;  %v400_v59 = vld [vmem:[%s2157_s13 + $0x4] sm:$0xf] }
  0x7e   :  { %v656_v28 = vadd.f32 %v655_v20, %v654_v23  ;;  %v771_v29 = vsel %vm743_vm3, %v1744_v51, 0.0  ;;  %v634_v30 = vand.u32 2147483647, %v618_v8  ;;  %v659_v16 = vsel %vm495_vm4, %v630_v17, 0.0  ;;  %v401_v60 = vld [vmem:[%s2157_s13 + $0x8] sm:$0xf] }
  0x7f   :  { %v645_v31 = vadd.f32 %v644_v22, %v643_v15  ;;  %v770_v32 = vadd.f32 %v1781_v24, %v768_v26  ;;  %v773_v33 = vsel %vm743_vm3, %v1746_v52, 0.0  ;;  %v648_v34 = vsel %vm215_vm2, %v633_v21, 0.0  ;;  %v370_v61 = vld [vmem:[%s2156_s9 + $0xc] sm:$0xf]  ;;  %v371_v2 = vld [vmem:[%s2156_s9 + $0x10] sm:$0xf] }
  0x80   :  { %v658_v55 = vadd.f32 %v657_v14, %v656_v28  ;;  %v661_v19 = vsel %vm495_vm4, %v632_v18, 0.0  ;;  %v1081_v36 = vand.u32 2147483647, %v1079_v25  ;;  %v1082_v37 = vand.u32 2147483647, %v1080_v49 }
  0x81   :  { %v647_v35 = vadd.f32 %v646_v27, %v645_v31  ;;  %v772_v38 = vadd.f32 %v771_v29, %v770_v32  ;;  %v663_v40 = vsel %vm495_vm4, %v634_v30, 0.0  ;;  %v402_v62 = vld [vmem:[%s2157_s13 + $0xc] sm:$0xf]  ;;  %v431_v63 = vsub.f32 %v367_v54, %v399_v58  ;;  %v403_v3 = vld [vmem:[%s2157_s13 + $0x10] sm:$0xf] }
  0x82   :  { %v660_v39 = vadd.f32 %v659_v16, %v658_v55  ;;  %v1084_v52 = vsel %vm1083_vm5, %v1081_v36, 0.0  ;;  %v1085_v43 = vsel %vm1083_vm5, %v1082_v37, 0.0  ;;  %v432_v0 = vsub.f32 %v368_v56, %v400_v59  ;;  %v372_v4 = vld [vmem:[%s2156_s9 + $0x14] sm:$0xf]  ;;  %v373_v6 = vld [vmem:[%s2156_s9 + $0x18] sm:$0xf] }
  0x83   :  { %v649_v51 = vadd.f32 %v648_v34, %v647_v35  ;;  %v774_v24 = vadd.f32 %v773_v33, %v772_v38  ;;  %v1086_v48 = vadd.f32 %v1085_v43, %v1084_v52  ;;  %v433_v1 = vsub.f32 %v369_v57, %v401_v60  ;;  %v404_v7 = vld [vmem:[%s2157_s13 + $0x14] sm:$0xf]  ;;  %v405_v8 = vld [vmem:[%s2157_s13 + $0x18] sm:$0xf]  ;;  %v374_v11 = vld [vmem:[%s2156_s9 + $0x1c] sm:$0xf] }
  0x84   :  { %v662_v41 = vadd.f32 %v661_v19, %v660_v39  ;;  %v434_v5 = vsub.f32 %v370_v61, %v402_v62  ;;  %v435_v9 = vsub.f32 %v371_v2, %v403_v3  ;;  %v463_v12 = vand.u32 2147483647, %v431_v63  ;;  %v406_v20 = vld [vmem:[%s2157_s13 + $0x1c] sm:$0xf]  ;;  %v375_v14 = vld [vmem:[%s2156_s9 + $0x20] sm:$0xf] }
  0x85   :  { %v775_v44 = vsel %vm743_vm3, %v774_v24, 0.0  ;;  %v665_v46 = vsel %vm215_vm2, %v649_v51, 0.0  ;;  %v1087_v53 = vsel %vm1083_vm5, %v1086_v48, 0.0  ;;  %v464_v13 = vand.u32 2147483647, %v432_v0 }
  0x86   :  { %v664_v45 = vadd.f32 %v663_v40, %v662_v41  ;;  %776 = vadd.xlane.f32.xlu1 %v775_v44  ;;  %v465_v10 = vand.u32 2147483647, %v433_v1  ;;  %v436_v17 = vsub.f32 %v372_v4, %v404_v7  ;;  %v466_v18 = vand.u32 2147483647, %v434_v5  ;;  %v407_v25 = vld [vmem:[%s2157_s13 + $0x20] sm:$0xf] }
  0x87   :  { %v437_v42 = vsub.f32 %v373_v6, %v405_v8  ;;  %v467_v21 = vand.u32 2147483647, %v435_v9  ;;  %v496_v22 = vsel %vm495_vm4, %v463_v12, 0.0  ;;  %v497_v23 = vsel %vm495_vm4, %v464_v13, 0.0  ;;  %v376_v29 = vld [vmem:[%s2156_s9 + $0x24] sm:$0xf] }
  0x88   :  { %v666_v47 = vsel %vm495_vm4, %v664_v45, 0.0  ;;  %v499_v15 = vsel %vm495_vm4, %v465_v10, 0.0  ;;  %v498_v49 = vadd.f32 %v497_v23, %v496_v22  ;;  %v438_v26 = vsub.f32 %v374_v11, %v406_v20  ;;  %v408_v30 = vld [vmem:[%s2157_s13 + $0x24] sm:$0xf]  ;;  %v377_v34 = vld [vmem:[%s2156_s9 + $0x28] sm:$0xf] }
  0x89   :  { %v667_v50 = vadd.f32 %v666_v47, %v665_v46  ;;  %v468_v27 = vand.u32 2147483647, %v436_v17  ;;  %v501_v28 = vsel %vm495_vm4, %v466_v18, 0.0  ;;  %v439_v16 = vsub.f32 %v375_v14, %v407_v25  ;;  %v409_v55 = vld [vmem:[%s2157_s13 + $0x28] sm:$0xf] }
  0x8a   :  { %v500_v31 = vadd.f32 %v499_v15, %v498_v49  ;;  %v469_v32 = vand.u32 2147483647, %v437_v42  ;;  %v503_v33 = vsel %vm495_vm4, %v467_v21, 0.0  ;;  %v440_v19 = vsub.f32 %v376_v29, %v408_v30  ;;  %v378_v38 = vld [vmem:[%s2156_s9 + $0x2c] sm:$0xf] }
  0x8b   :  { %668 = vadd.xlane.f32.xlu0 %v667_v50  ;;  %v470_v36 = vand.u32 2147483647, %v438_v26  ;;  %v505_v37 = vsel %vm495_vm4, %v468_v27, 0.0  ;;  %v410_v39 = vld [vmem:[%s2157_s13 + $0x2c] sm:$0xf]  ;;  %v441_v40 = vsub.f32 %v377_v34, %v409_v55 }
  0x8c   :  { %v502_v35 = vadd.f32 %v501_v28, %v500_v31  ;;  %v471_v24 = vand.u32 2147483647, %v439_v16  ;;  %v507_v41 = vsel %vm495_vm4, %v469_v32, 0.0  ;;  %v379_v52 = vld [vmem:[%s2156_s9 + $0x30] sm:$0xf]  ;;  %v442_v45 = vsub.f32 %v378_v38, %v410_v39 }
  0x8d   :  { %v411_v43 = vld [vmem:[%s2157_s13 + $0x30] sm:$0xf]  ;;  %v472_v46 = vand.u32 2147483647, %v440_v19  ;;  %v509_v47 = vsel %vm495_vm4, %v470_v36, 0.0 }
  0x8e   :  { %v504_v51 = vadd.f32 %v503_v33, %v502_v35  ;;  %v380_v48 = vld [vmem:[%s2156_s9 + $0x34] sm:$0xf]  ;;  %v443_v54 = vsub.f32 %v379_v52, %v411_v43  ;;  %v473_v56 = vand.u32 2147483647, %v441_v40  ;;  %v511_v57 = vsel %vm495_vm4, %v471_v24, 0.0 }
  0x8f   :  { %1088 = vadd.xlane.f32.xlu0 %v1087_v53  ;;  %v412_v50 = vld [vmem:[%s2157_s13 + $0x34] sm:$0xf]  ;;  %v381_v58 = vld [vmem:[%s2156_s9 + $0x38] sm:$0xf]  ;;  %v382_v59 = vld [vmem:[%s2156_s9 + $0x3c] sm:$0xf] }
  0x90   :  { %v506_v44 = vadd.f32 %v505_v37, %v504_v51  ;;  %v413_v60 = vld [vmem:[%s2157_s13 + $0x38] sm:$0xf]  ;;  %v383_v62 = vld [vmem:[%s2156_s9 + $0x40] sm:$0xf]  ;;  %v384_v63 = vld [vmem:[%s2156_s9 + $0x44] sm:$0xf]  ;;  %v444_v0 = vsub.f32 %v380_v48, %v412_v50 }
  0x91   :  { %v474_v1 = vand.u32 2147483647, %v442_v45  ;;  %v513_v2 = vsel %vm495_vm4, %v472_v46, 0.0  ;;  %v385_v3 = vld [vmem:[%s2156_s9 + $0x48] sm:$0xf]  ;;  %v445_v17 = vsub.f32 %v381_v58, %v413_v60  ;;  %v515_v11 = vsel %vm495_vm4, %v473_v56, 0.0 }
  0x92   :  { %v508_v53 = vadd.f32 %v507_v41, %v506_v44  ;;  %v386_v4 = vld [vmem:[%s2156_s9 + $0x4c] sm:$0xf]  ;;  %v414_v5 = vld [vmem:[%s2157_s13 + $0x3c] sm:$0xf]  ;;  %v415_v6 = vld [vmem:[%s2157_s13 + $0x40] sm:$0xf] }
  0x93   :  { %v416_v7 = vld [vmem:[%s2157_s13 + $0x44] sm:$0xf]  ;;  %v387_v9 = vld [vmem:[%s2156_s9 + $0x50] sm:$0xf]  ;;  %v388_v12 = vld [vmem:[%s2156_s9 + $0x54] sm:$0xf]  ;;  %v446_v49 = vsub.f32 %v382_v59, %v414_v5  ;;  %v447_v31 = vsub.f32 %v383_v62, %v415_v6 }
  0x94   :  { %v510_v61 = vadd.f32 %v509_v47, %v508_v53  ;;  %v389_v13 = vld [vmem:[%s2156_s9 + $0x58] sm:$0xf]  ;;  %v417_v10 = vld [vmem:[%s2157_s13 + $0x48] sm:$0xf]  ;;  %v475_v18 = vand.u32 2147483647, %v443_v54  ;;  %v448_v16 = vsub.f32 %v384_v63, %v416_v7 }
  0x95   :  { %v390_v20 = vld [vmem:[%s2156_s9 + $0x5c] sm:$0xf]  ;;  %v391_v42 = vld [vmem:[%s2156_s9 + $0x60] sm:$0xf]  ;;  %v418_v21 = vld [vmem:[%s2157_s13 + $0x4c] sm:$0xf]  ;;  %v449_v34 = vsub.f32 %v385_v3, %v417_v10 }
  0x96   :  { %v512_v8 = vadd.f32 %v511_v57, %v510_v61  ;;  %v419_v22 = vld [vmem:[%s2157_s13 + $0x50] sm:$0xf]  ;;  %v420_v23 = vld [vmem:[%s2157_s13 + $0x54] sm:$0xf]  ;;  %v392_v14 = vld [vmem:[%s2156_s9 + $0x64] sm:$0xf]  ;;  %v450_v55 = vsub.f32 %v386_v4, %v418_v21 }
  0x97   :  { %v421_v25 = vld [vmem:[%s2157_s13 + $0x58] sm:$0xf]  ;;  %v476_v26 = vand.u32 2147483647, %v444_v0  ;;  %v517_v27 = vsel %vm495_vm4, %v474_v1, 0.0  ;;  %v519_v19 = vsel %vm495_vm4, %v475_v18, 0.0  ;;  %v451_v39 = vsub.f32 %v387_v9, %v419_v22 }
  0x98   :  { %v514_v15 = vadd.f32 %v513_v2, %v512_v8  ;;  %v393_v28 = vld [vmem:[%s2156_s9 + $0x68] sm:$0xf]  ;;  %v422_v29 = vld [vmem:[%s2157_s13 + $0x5c] sm:$0xf]  ;;  %v423_v30 = vld [vmem:[%s2157_s13 + $0x60] sm:$0xf]  ;;  %v452_v51 = vsub.f32 %v388_v12, %v420_v23  ;;  %v453_v40 = vsub.f32 %v389_v13, %v421_v25 }
  0x99   :  { %v424_v33 = vld [vmem:[%s2157_s13 + $0x64] sm:$0xf]  ;;  %v477_v35 = vand.u32 2147483647, %v445_v17  ;;  %v394_v36 = vld [vmem:[%s2156_s9 + $0x6c] sm:$0xf]  ;;  %v454_v43 = vsub.f32 %v390_v20, %v422_v29  ;;  %v455_v44 = vsub.f32 %v391_v42, %v423_v30 }
  0x9a   :  { %v516_v32 = vadd.f32 %v515_v11, %v514_v15  ;;  %v425_v37 = vld [vmem:[%s2157_s13 + $0x68] sm:$0xf]  ;;  %v426_v38 = vld [vmem:[%s2157_s13 + $0x6c] sm:$0xf]  ;;  %v395_v41 = vld [vmem:[%s2156_s9 + $0x70] sm:$0xf]  ;;  %v456_v54 = vsub.f32 %v392_v14, %v424_v33 }
  0x9b   :  { %v427_v52 = vld [vmem:[%s2157_s13 + $0x70] sm:$0xf]  ;;  %v478_v45 = vand.u32 2147483647, %v446_v49  ;;  %v521_v46 = vsel %vm495_vm4, %v476_v26, 0.0  ;;  %v457_v61 = vsub.f32 %v393_v28, %v425_v37  ;;  %v523_v0 = vsel %vm495_vm4, %v477_v35, 0.0 }
  0x9c   :  { %v518_v24 = vadd.f32 %v517_v27, %v516_v32  ;;  %v396_v47 = vld [vmem:[%s2156_s9 + $0x74] sm:$0xf]  ;;  %v397_v48 = vld [vmem:[%s2156_s9 + $0x78] sm:$0xf]  ;;  %v479_v56 = vand.u32 2147483647, %v447_v31  ;;  %v458_v7 = vsub.f32 %v394_v36, %v426_v38  ;;  %v459_v13 = vsub.f32 %v395_v41, %v427_v52 }
  0x9d   :  { %v428_v50 = vld [vmem:[%s2157_s13 + $0x74] sm:$0xf]  ;;  %v429_v53 = vld [vmem:[%s2157_s13 + $0x78] sm:$0xf]  ;;  %v480_v57 = vand.u32 2147483647, %v448_v16 }
  0x9e   :  { %v520_v58 = vadd.f32 %v519_v19, %v518_v24  ;;  %v398_v59 = vld [vmem:[%s2156_s9 + $0x7c] sm:$0xf]  ;;  %v481_v62 = vand.u32 2147483647, %v449_v34  ;;  %v482_v63 = vand.u32 2147483647, %v450_v55  ;;  %v460_v20 = vsub.f32 %v396_v47, %v428_v50 }
  0x9f   :  { %v430_v60 = vld [vmem:[%s2157_s13 + $0x7c] sm:$0xf]  ;;  %v483_v1 = vand.u32 2147483647, %v451_v39  ;;  %v484_v2 = vand.u32 2147483647, %v452_v51  ;;  %v461_v42 = vsub.f32 %v397_v48, %v429_v53 }
  0xa0   :  { %v485_v3 = vand.u32 2147483647, %v453_v40  ;;  %v522_v4 = vadd.f32 %v521_v46, %v520_v58  ;;  %v787_v5 = vld [vmem:[%s2158_s17] sm:$0x7]  ;;  %v788_v6 = vld [vmem:[%s2158_s17 + $0x4] sm:$0x7]  ;;  %v462_v15 = vsub.f32 %v398_v59, %v430_v60 }
  0xa1   :  { %v486_v8 = vand.u32 2147483647, %v454_v43  ;;  %v487_v9 = vand.u32 2147483647, %v455_v44  ;;  %v525_v12 = vsel %vm495_vm4, %v478_v45, 0.0  ;;  %v527_v21 = vsel %vm495_vm4, %v479_v56, 0.0 }
  0xa2   :  { %v1903_v10 = vand.u32 2147483647, %v456_v54  ;;  %v524_v17 = vadd.f32 %v523_v0, %v522_v4  ;;  %v819_v18 = vld [vmem:[%s2159_s21] sm:$0x7]  ;;  %v820_v11 = vld [vmem:[%s2159_s21 + $0x4] sm:$0x7] }
  0xa3   :  { %v789_v22 = vld [vmem:[%s2158_s17 + $0x8] sm:$0x7]  ;;  %v1910_v14 = vand.u32 2147483647, %v457_v61  ;;  %v790_v49 = vld [vmem:[%s2158_s17 + $0xc] sm:$0x7]  ;;  %v851_v29 = vsub.f32 %v787_v5, %v819_v18  ;;  %v852_v30 = vsub.f32 %v788_v6, %v820_v11 }
  0xa4   :  { %v821_v23 = vld [vmem:[%s2159_s21 + $0x8] sm:$0x7]  ;;  %v526_v25 = vadd.f32 %v525_v12, %v524_v17  ;;  %v822_v26 = vld [vmem:[%s2159_s21 + $0xc] sm:$0x7]  ;;  %v1914_v27 = vand.u32 2147483647, %v458_v7 }
  0xa5   :  { %v529_v28 = vsel %vm495_vm4, %v480_v57, 0.0  ;;  %v1917_v31 = vand.u32 2147483647, %v459_v13  ;;  %v791_v32 = vld [vmem:[%s2158_s17 + $0x10] sm:$0x7]  ;;  %v853_v34 = vsub.f32 %v789_v22, %v821_v23  ;;  %v531_v19 = vsel %vm495_vm4, %v481_v62, 0.0 }
  0xa6   :  { %v528_v16 = vadd.f32 %v527_v21, %v526_v25  ;;  %v823_v33 = vld [vmem:[%s2159_s21 + $0x10] sm:$0x7]  ;;  %v1921_v55 = vand.u32 2147483647, %v460_v20  ;;  %v1923_v35 = vand.u32 2147483647, %v461_v42  ;;  %v854_v36 = vsub.f32 %v790_v49, %v822_v26 }
  0xa7   :  { %v1926_v37 = vand.u32 2147483647, %v462_v15  ;;  %v792_v39 = vld [vmem:[%s2158_s17 + $0x14] sm:$0x7]  ;;  %v533_v40 = vsel %vm495_vm4, %v482_v63, 0.0  ;;  %v855_v24 = vsub.f32 %v791_v32, %v823_v33  ;;  %v535_v47 = vsel %vm495_vm4, %v483_v1, 0.0 }
  0xa8   :  { %v530_v38 = vadd.f32 %v529_v28, %v528_v16  ;;  %v824_v51 = vld [vmem:[%s2159_s21 + $0x14] sm:$0x7]  ;;  %v883_v41 = vand.u32 2147483647, %v851_v29  ;;  %v884_v52 = vand.u32 2147483647, %v852_v30 }
  0xa9   :  { %v793_v44 = vld [vmem:[%s2158_s17 + $0x18] sm:$0x7]  ;;  %v885_v46 = vand.u32 2147483647, %v853_v34  ;;  %v537_v48 = vsel %vm495_vm4, %v484_v2, 0.0  ;;  %v856_v50 = vsub.f32 %v792_v39, %v824_v51  ;;  %v1936_v54 = vld [vmem:[%s2160_s25] sm:$0xff] }
  0xaa   :  { %v532_v43 = vadd.f32 %v531_v19, %v530_v38  ;;  %v825_v45 = vld [vmem:[%s2159_s21 + $0x18] sm:$0x7]  ;;  %v886_v53 = vand.u32 2147483647, %v854_v36  ;;  %v1939_v56 = vld [vmem:[%s2160_s25 + $0x8] sm:$0xff]  ;;  %v539_v58 = vsel %vm495_vm4, %v485_v3, 0.0 }
  0xab   :  { %v541_v59 = vsel %vm495_vm4, %v486_v8, 0.0  ;;  %v794_v60 = vld [vmem:[%s2158_s17 + $0x1c] sm:$0x7]  ;;  %v857_v62 = vsub.f32 %v793_v44, %v825_v45  ;;  %v887_v63 = vand.u32 2147483647, %v855_v24  ;;  %v916_v0 = vsel %vm915_vm6, %v883_v41, 0.0 }
  0xac   :  { %v534_v57 = vadd.f32 %v533_v40, %v532_v43  ;;  %v826_v61 = vld [vmem:[%s2159_s21 + $0x1c] sm:$0x7]  ;;  %v917_v1 = vsel %vm915_vm6, %v884_v52, 0.0  ;;  %v1042_v2 = vld [vmem:[%s2161_s8] sm:$0xff]  ;;  %v1043_v4 = vld [vmem:[%s2161_s8 + $0x8] sm:$0xff]  ;;  %v543_v6 = vsel %vm495_vm4, %v487_v9, 0.0 }
  0xad   :  { %v795_v3 = vld [vmem:[%s2158_s17 + $0x20] sm:$0x7]  ;;  %v918_v8 = vadd.f32 %v917_v1, %v916_v0  ;;  %v919_v12 = vsel %vm915_vm6, %v885_v46, 0.0  ;;  %v545_v13 = vsel %vm495_vm4, %v1903_v10, 0.0  ;;  %v796_v17 = vld [vmem:[%s2158_s17 + $0x24] sm:$0x7]  ;;  %v858_v18 = vsub.f32 %v794_v60, %v826_v61 }
  0xae   :  { %v536_v5 = vadd.f32 %v535_v47, %v534_v57  ;;  %v827_v7 = vld [vmem:[%s2159_s21 + $0x20] sm:$0x7]  ;;  %v888_v11 = vand.u32 2147483647, %v856_v50  ;;  %v921_v20 = vsel %vm915_vm6, %v886_v53, 0.0  ;;  %v1046_v15 = vsub.f32 %v1936_v54, %v1042_v2  ;;  %v1040_v29 = vld [vmem:[%s2160_s25 + $0x10] sm:$0xff] }
  0xaf   :  { %v797_v21 = vld [vmem:[%s2158_s17 + $0x28] sm:$0x7]  ;;  %v828_v22 = vld [vmem:[%s2159_s21 + $0x24] sm:$0x7]  ;;  %v920_v23 = vadd.f32 %v919_v12, %v918_v8  ;;  %v1047_v10 = vsub.f32 %v1939_v56, %v1043_v4  ;;  %v547_v25 = vsel %vm495_vm4, %v1910_v14, 0.0  ;;  %v859_v49 = vsub.f32 %v795_v3, %v827_v7  ;;  %v1041_v30 = vld [vmem:[%s2160_s25 + $0x18] sm:$0xff] }
  0xb0   :  { %v538_v42 = vadd.f32 %v537_v48, %v536_v5  ;;  %v829_v9 = vld [vmem:[%s2159_s21 + $0x28] sm:$0x7]  ;;  %v889_v26 = vand.u32 2147483647, %v857_v62  ;;  %v923_v28 = vsel %vm915_vm6, %v887_v63, 0.0  ;;  %v549_v32 = vsel %vm495_vm4, %v1914_v27, 0.0 }
  0xb1   :  { %v1971_v33 = vsel %vm495_vm4, %v1917_v31, 0.0  ;;  %v798_v34 = vld [vmem:[%s2158_s17 + $0x2c] sm:$0x7]  ;;  %v922_v19 = vadd.f32 %v921_v20, %v920_v23  ;;  %v1044_v14 = vld [vmem:[%s2161_s8 + $0x10] sm:$0xff]  ;;  %v1045_v36 = vld [vmem:[%s2161_s8 + $0x18] sm:$0xff]  ;;  %v860_v39 = vsub.f32 %v796_v17, %v828_v22  ;;  %v861_v51 = vsub.f32 %v797_v21, %v829_v9 }
  0xb2   :  { %v540_v16 = vadd.f32 %v539_v58, %v538_v42  ;;  %v830_v38 = vld [vmem:[%s2159_s21 + $0x2c] sm:$0x7]  ;;  %v890_v40 = vand.u32 2147483647, %v858_v18  ;;  %v925_v24 = vsel %vm915_vm6, %v888_v11, 0.0  ;;  %v1980_v27 = vsel %vm495_vm4, %v1921_v55, 0.0 }
  0xb3   :  { %v1984_v31 = vsel %vm495_vm4, %v1923_v35, 0.0  ;;  %v799_v52 = vld [vmem:[%s2158_s17 + $0x30] sm:$0x7]  ;;  %v924_v44 = vadd.f32 %v923_v28, %v922_v19  ;;  %v800_v45 = vld [vmem:[%s2158_s17 + $0x34] sm:$0x7]  ;;  %v927_v47 = vsel %vm915_vm6, %v889_v26, 0.0  ;;  %v1048_v48 = vsub.f32 %v1040_v29, %v1044_v14 }
  0xb4   :  { %v542_v41 = vadd.f32 %v541_v59, %v540_v16  ;;  %v831_v43 = vld [vmem:[%s2159_s21 + $0x30] sm:$0x7]  ;;  %v891_v46 = vand.u32 2147483647, %v859_v49  ;;  %v1049_v50 = vsub.f32 %v1041_v30, %v1045_v36  ;;  %v801_v54 = vld [vmem:[%s2158_s17 + $0x38] sm:$0x7]  ;;  %v862_v57 = vsub.f32 %v798_v34, %v830_v38 }
  0xb5   :  { %v832_v56 = vld [vmem:[%s2159_s21 + $0x34] sm:$0x7]  ;;  %v926_v58 = vadd.f32 %v925_v24, %v924_v44 }
  0xb6   :  { %v544_v53 = vadd.f32 %v543_v6, %v542_v41 }
  0xb7   :  { %66 = vsyncpa [#allocation3], 0  ;;  %v863_v55 = vsub.f32 %v799_v52, %v831_v43  ;;  %v892_v35 = vand.u32 2147483647, %v860_v39  ;;  %v893_v59 = vand.u32 2147483647, %v861_v51  ;;  %v928_v63 = vadd.f32 %v927_v47, %v926_v58 }
  0xb8   :  { %v929_v60 = vsel %vm915_vm6, %v890_v40, 0.0  ;;  %v546_v61 = vadd.f32 %v545_v13, %v544_v53  ;;  %v833_v62 = vld [vmem:[%s2159_s21 + $0x38] sm:$0x7]  ;;  %s2162_s14 = sld [smem:[#allocation13_spill]]  ;;  %v1050_v0 = vand.u32 2147483647, %v1046_v15  ;;  %v864_v17 = vsub.f32 %v800_v45, %v832_v56 }
  0xb9   :  { %s2163_s19 = sld [smem:[#allocation14_spill]]  ;;  %v1051_v1 = vand.u32 2147483647, %v1047_v10  ;;  %v802_v2 = vld [vmem:[%s2158_s17 + $0x3c] sm:$0x7]  ;;  %v931_v6 = vsel %vm915_vm6, %v891_v46, 0.0  ;;  %v930_v18 = vadd.f32 %v929_v60, %v928_v63  ;;  %v865_v42 = vsub.f32 %v801_v54, %v833_v62 }
  0xba   :  { %v1996_v4 = vld [vmem:[%s2158_s17 + $0x40] sm:$0x7]  ;;  %v834_v5 = vld [vmem:[%s2159_s21 + $0x3c] sm:$0x7]  ;;  %v1052_v3 = vand.u32 2147483647, %v1048_v48  ;;  %v548_v8 = vadd.f32 %v547_v25, %v546_v61 }
  0xbb   :  { %v1053_v7 = vand.u32 2147483647, %v1049_v50  ;;  %vm1054_vm7 = vcmask 130048   ;;  %v557_v12 = vsel %vm495_vm4, %v1926_v37, 0.0  ;;  %v835_v13 = vld [vmem:[%s2159_s21 + $0x40] sm:$0x7]  ;;  %v932_v10 = vadd.f32 %v931_v6, %v930_v18 }
  0xbc   :  { %v894_v21 = vand.u32 2147483647, %v862_v57  ;;  %v895_v22 = vand.u32 2147483647, %v863_v55  ;;  %v933_v9 = vsel %vm915_vm6, %v892_v35, 0.0  ;;  %v550_v23 = vadd.f32 %v549_v32, %v548_v8  ;;  %s2164_s24 = sld [smem:[#allocation17_spill]] }
  0xbd   :  { %v804_v15 = vld [vmem:[%s2158_s17 + $0x44] sm:$0x7]  ;;  %v935_v37 = vsel %vm915_vm6, %v893_v59, 0.0  ;;  %v1055_v25 = vsel %vm1054_vm7, %v1050_v0, 0.0  ;;  %v2012_v28 = vld [vmem:[%s2158_s17 + $0x48] sm:$0x7]  ;;  %v866_v38 = vsub.f32 %v802_v2, %v834_v5  ;;  %v867_v39 = vsub.f32 %v1996_v4, %v835_v13 }
  0xbe   :  { %v1099_v11 = vld [vmem:[%s2162_s14] sm:$0xff]  ;;  %v1100_v49 = vld [vmem:[%s2162_s14 + $0x8] sm:$0xff]  ;;  %v1056_v29 = vsel %vm1054_vm7, %v1052_v3, 0.0  ;;  %v1058_v30 = vsel %vm1054_vm7, %v1051_v1, 0.0  ;;  %v1059_v16 = vsel %vm1054_vm7, %v1053_v7, 0.0  ;;  %v552_v34 = vadd.f32 %v1971_v33, %v550_v23  ;;  %s2166_s12 = sld [smem:[#allocation16_spill]] }
  0xbf   :  { %v1101_v20 = vld [vmem:[%s2163_s19] sm:$0xff]  ;;  %v1102_v26 = vld [vmem:[%s2163_s19 + $0x8] sm:$0xff]  ;;  %v934_v51 = vadd.f32 %v933_v9, %v932_v10  ;;  %v896_v40 = vand.u32 2147483647, %v864_v17  ;;  %v897_v24 = vand.u32 2147483647, %v865_v42  ;;  %v1057_v47 = vadd.f32 %v1056_v29, %v1055_v25 }
  0xc0   :  { %v1103_v32 = vsub.f32 %v1099_v11, %v1101_v20  ;;  %v2019_v19 = vld [vmem:[%s2158_s17 + $0x4c] sm:$0x7]  ;;  %v836_v14 = vld [vmem:[%s2159_s21 + $0x44] sm:$0x7]  ;;  %v837_v36 = vld [vmem:[%s2159_s21 + $0x48] sm:$0x7]  ;;  %v1104_v52 = vsub.f32 %v1100_v49, %v1102_v26  ;;  %v554_v43 = vadd.f32 %v1980_v27, %v552_v34  ;;  %v1060_v48 = vadd.f32 %v1059_v16, %v1058_v30 }
  0xc1   :  { %v937_v41 = vsel %vm915_vm6, %v894_v21, 0.0  ;;  %v807_v44 = vld [vmem:[%s2158_s17 + $0x50] sm:$0x7]  ;;  %v838_v45 = vld [vmem:[%s2159_s21 + $0x4c] sm:$0x7]  ;;  %v936_v33 = vadd.f32 %v935_v37, %v934_v51  ;;  %v868_v50 = vsub.f32 %v804_v15, %v836_v14  ;;  %v939_v53 = vsel %vm915_vm6, %v895_v22, 0.0 }
  0xc2   :  { %v839_v46 = vld [vmem:[%s2159_s21 + $0x50] sm:$0x7]  ;;  %v1105_v54 = vand.u32 2147483647, %v1103_v32  ;;  %v1106_v56 = vand.u32 2147483647, %v1104_v52  ;;  %v556_v57 = vadd.f32 %v1984_v31, %v554_v43  ;;  %v869_v58 = vsub.f32 %v2012_v28, %v837_v36 }
  0xc3   :  { %v938_v27 = vadd.f32 %v937_v41, %v936_v33  ;;  %vm1107_vm8 = vcmask 195584   ;;  %v808_v55 = vld [vmem:[%s2158_s17 + $0x54] sm:$0x7]  ;;  %v870_v35 = vsub.f32 %v2019_v19, %v838_v45  ;;  %v871_v59 = vsub.f32 %v807_v44, %v839_v46  ;;  %v1160_v62 = vld [vmem:[%s2164_s24] sm:$0x1] }
  0xc4   :  { %v898_v60 = vand.u32 2147483647, %v866_v38  ;;  %v941_v61 = vsel %vm915_vm6, %v896_v40, 0.0  ;;  %v558_v63 = vadd.f32 %v557_v12, %v556_v57  ;;  %v840_v0 = vld [vmem:[%s2159_s21 + $0x54] sm:$0x7]  ;;  %v1061_v31 = vsel %vm1054_vm7, %v1057_v47, 0.0 }
  0xc5   :  { %v940_v1 = vadd.f32 %v939_v53, %v938_v27  ;;  %v1062_v2 = vsel %vm1054_vm7, %v1060_v48, 0.0  ;;  %v1161_v4 = vld [vmem:[%s2164_s24 + $0x1] sm:$0x1]  ;;  %v2041_v5 = vld [vmem:[%s2158_s17 + $0x58] sm:$0x7]  ;;  %v943_v3 = vsel %vm915_vm6, %v897_v24, 0.0  ;;  %v872_v9 = vsub.f32 %v808_v55, %v840_v0 }
  0xc6   :  { %v899_v6 = vand.u32 2147483647, %v867_v39  ;;  %v1108_v7 = vsel %vm1107_vm8, %v1105_v54, 0.0  ;;  %v1109_v8 = vsel %vm1107_vm8, %v1106_v56, 0.0  ;;  %v559_v12 = vsel %vm495_vm4, %v558_v63, 0.0 }
  0xc7   :  { %v900_v13 = vand.u32 2147483647, %v868_v50  ;;  %v942_v17 = vadd.f32 %v941_v61, %v940_v1  ;;  %v1297_v18 = vadd.f32 -1.0, %v1160_v62  ;;  %v1204_v11 = vld [vmem:[%s1559_s3] sm:$0x1]  ;;  %560 = vadd.xlane.f32.xlu1 %v559_v12  ;;  %v945_v42 = vsel %vm915_vm6, %v898_v60, 0.0  ;;  %v141_v52 = vpop.xlane.xlu0 %140 }
  0xc8   :  { %v841_v20 = vld [vmem:[%s2159_s21 + $0x58] sm:$0x7]  ;;  %v1063_v21 = vadd.f32 %v1062_v2, %v1061_v31  ;;  %v1298_v22 = vadd.f32 -1.0, %v1161_v4  ;;  %vm1166_vm9 = vcmask 188416   ;;  %v1110_v15 = vadd.f32 %v1109_v8, %v1108_v7  ;;  %v1205_v37 = vld [vmem:[%s1559_s3 + $0x1] sm:$0x1] }
  0xc9   :  { %v944_v23 = vadd.f32 %v943_v3, %v942_v17  ;;  %v1164_v10 = vmul.f32 %v1297_v18, %v1297_v18  ;;  %v901_v25 = vand.u32 2147483647, %v869_v58  ;;  %v947_v49 = vsel %vm915_vm6, %v899_v6, 0.0  ;;  %v810_v29 = vld [vmem:[%s2158_s17 + $0x5c] sm:$0x7]  ;;  %v2065_v58 = vpop.xlane.xlu1 %1004  ;;  %s2165_s3 = sld [smem:[#allocation15_spill]] }
  0xca   :  { %v1165_v26 = vmul.f32 %v1298_v22, %v1298_v22  ;;  %v1301_v28 = vadd.f32 -1.0, %v1204_v11  ;;  %v873_v30 = vsub.f32 %v2041_v5, %v841_v20  ;;  %v902_v16 = vand.u32 2147483647, %v870_v35  ;;  %v842_v19 = vld [vmem:[%s2159_s21 + $0x5c] sm:$0x7] }
  0xcb   :  { %v946_v32 = vadd.f32 %v945_v42, %v944_v23  ;;  %v1167_v34 = vsel %vm1166_vm9, %v1164_v10, 0.0  ;;  %v949_v14 = vsel %vm915_vm6, %v900_v13, 0.0  ;;  %1064 = vadd.xlane.f32.xlu1 %v1063_v21  ;;  %v1302_v38 = vadd.f32 -1.0, %v1205_v37  ;;  %v811_v46 = vld [vmem:[%s2158_s17 + $0x60] sm:$0x7]  ;;  %v2081_v17 = vpop.xlane.xlu0 %1027 }
  0xcc   :  { %v1168_v36 = vsel %vm1166_vm9, %v1165_v26, 0.0  ;;  %v1208_v39 = vmul.f32 %v1301_v28, %v1301_v28  ;;  %v903_v51 = vand.u32 2147483647, %v871_v59  ;;  %v1111_v24 = vsel %vm1107_vm8, %v1110_v15, 0.0  ;;  %v843_v33 = vld [vmem:[%s2159_s21 + $0x60] sm:$0x7] }
  0xcd   :  { %v948_v40 = vadd.f32 %v947_v49, %v946_v32  ;;  %v1169_v41 = vadd.f32 %v1168_v36, %v1167_v34  ;;  %v951_v43 = vsel %vm915_vm6, %v901_v25, 0.0  ;;  %v1209_v44 = vmul.f32 %v1302_v38, %v1302_v38  ;;  %v812_v27 = vld [vmem:[%s2158_s17 + $0x64] sm:$0x7]  ;;  %v813_v61 = vld [vmem:[%s2158_s17 + $0x68] sm:$0x7]  ;;  %v1129_v36 = vld [vmem:[%s2166_s12 + $0x10] sm:$0xff] }
  0xce   :  { %vm1210_vm10 = vcmask 253952   ;;  %v142_v45 = vrot.slane %v141_v52, 4  ;;  %v874_v47 = vsub.f32 %v810_v29, %v842_v19  ;;  %v904_v53 = vand.u32 2147483647, %v872_v9  ;;  %v844_v55 = vld [vmem:[%s2159_s21 + $0x64] sm:$0x7] }
  0xcf   :  { %v950_v48 = vadd.f32 %v949_v14, %v948_v40  ;;  %v1211_v50 = vsel %vm1210_vm10, %v1208_v39, 0.0  ;;  %v953_v54 = vsel %vm915_vm6, %v902_v16, 0.0  ;;  %1112 = vadd.xlane.f32.xlu1 %v1111_v24  ;;  %v1212_v56 = vsel %vm1210_vm10, %v1209_v44, 0.0  ;;  %v814_v31 = vld [vmem:[%s2158_s17 + $0x6c] sm:$0x7]  ;;  %v1123_v21 = vld [vmem:[%s2165_s3] sm:$0xff] }
  0xd0   :  { %v143_v57 = vadd.f32 %v142_v45, %v141_v52  ;;  %v1170_v59 = vsel %vm1166_vm9, %v1169_v41, 0.0  ;;  %v1213_v60 = vadd.f32 %v1212_v56, %v1211_v50  ;;  %v875_v62 = vsub.f32 %v811_v46, %v843_v33  ;;  %v815_v2 = vld [vmem:[%s2158_s17 + $0x70] sm:$0x7]  ;;  %v845_v4 = vld [vmem:[%s2159_s21 + $0x68] sm:$0x7]  ;;  %v1127_v29 = vld [vmem:[%s2166_s12] sm:$0xff] }
  0xd1   :  { %v952_v35 = vadd.f32 %v951_v43, %v950_v48  ;;  %v905_v63 = vand.u32 2147483647, %v873_v30  ;;  %v955_v0 = vsel %vm915_vm6, %v903_v51, 0.0  ;;  %v816_v6 = vld [vmem:[%s2158_s17 + $0x74] sm:$0x7]  ;;  %v876_v8 = vsub.f32 %v812_v27, %v844_v55  ;;  %v1124_v28 = vld [vmem:[%s2165_s3 + $0x8] sm:$0xff] }
  0xd2   :  { %v144_v1 = vrot.slane %v143_v57, 2  ;;  %v2077_v3 = vld [vmem:[%s2158_s17 + $0x78] sm:$0x7]  ;;  %v846_v7 = vld [vmem:[%s2159_s21 + $0x6c] sm:$0x7]  ;;  %v957_v13 = vsel %vm915_vm6, %v904_v53, 0.0  ;;  %v877_v23 = vsub.f32 %v813_v61, %v845_v4  ;;  %v1131_v45 = vsub.f32 %v1123_v21, %v1127_v29 }
  0xd3   :  { %v954_v5 = vadd.f32 %v953_v54, %v952_v35  ;;  %v906_v12 = vand.u32 2147483647, %v874_v47  ;;  %1171 = vadd.xlane.f32.xlu1 %v1170_v59  ;;  %v847_v11 = vld [vmem:[%s2159_s21 + $0x70] sm:$0x7]  ;;  %v848_v20 = vld [vmem:[%s2159_s21 + $0x74] sm:$0x7]  ;;  %v878_v49 = vsub.f32 %v814_v31, %v846_v7 }
  0xd4   :  { %v145_v18 = vadd.f32 %v144_v1, %v143_v57  ;;  %v1214_v22 = vsel %vm1210_vm10, %v1213_v60, 0.0  ;;  %v849_v9 = vld [vmem:[%s2159_s21 + $0x78] sm:$0x7]  ;;  %v907_v15 = vand.u32 2147483647, %v875_v62  ;;  %v959_v10 = vsel %vm915_vm6, %v905_v63, 0.0 }
  0xd5   :  { %v956_v42 = vadd.f32 %v955_v0, %v954_v5  ;;  %v1128_v30 = vld [vmem:[%s2166_s12 + $0x8] sm:$0xff]  ;;  %v879_v32 = vsub.f32 %v815_v2, %v847_v11  ;;  %v908_v34 = vand.u32 2147483647, %v876_v8  ;;  %v961_v19 = vsel %vm915_vm6, %v906_v12, 0.0  ;;  %v1125_v14 = vld [vmem:[%s2165_s3 + $0x10] sm:$0xff]  ;;  %v1126_v24 = vld [vmem:[%s2165_s3 + $0x18] sm:$0xff] }
  0xd6   :  { %v146_v25 = vrot.slane %v145_v18, 1  ;;  %v880_v39 = vsub.f32 %v816_v6, %v848_v20  ;;  %v881_v51 = vsub.f32 %v2077_v3, %v849_v9  ;;  %v1130_v41 = vld [vmem:[%s2166_s12 + $0x18] sm:$0xff]  ;;  %v909_v43 = vand.u32 2147483647, %v877_v23  ;;  %v1226_v29 = vld [vmem:[%s1564_s29] sm:$0x1] }
  0xd7   :  { %v958_v26 = vadd.f32 %v957_v13, %v956_v42  ;;  %1215 = vadd.xlane.f32.xlu1 %v1214_v22  ;;  %v963_v44 = vsel %vm915_vm6, %v907_v15, 0.0  ;;  %v1132_v46 = vsub.f32 %v1124_v28, %v1128_v30  ;;  %v818_v47 = vld [vmem:[%s2158_s17 + $0x7c] sm:$0x7]  ;;  %v1133_v53 = vsub.f32 %v1125_v14, %v1129_v36  ;;  %v1182_v13 = vld [vmem:[%s1554_s30] sm:$0x1] }
  0xd8   :  { %v147_v38 = vadd.f32 %v146_v25, %v145_v18  ;;  %v850_v48 = vld [vmem:[%s2159_s21 + $0x7c] sm:$0x7]  ;;  %v910_v57 = vand.u32 2147483647, %v878_v49  ;;  %v911_v27 = vand.u32 2147483647, %v879_v32  ;;  %v1134_v35 = vsub.f32 %v1126_v24, %v1130_v41 }
  0xd9   :  { %v960_v40 = vadd.f32 %v959_v10, %v958_v26  ;;  %v965_v55 = vsel %vm915_vm6, %v908_v34, 0.0  ;;  %v912_v59 = vand.u32 2147483647, %v880_v39  ;;  %v882_v63 = vsub.f32 %v818_v47, %v850_v48  ;;  %v1183_v18 = vld [vmem:[%s1554_s30 + $0x1] sm:$0x1] }
  0xda   :  { %1305 = vpush %v147_v38  ;;  %v967_v0 = vsel %vm915_vm6, %v909_v43, 0.0  ;;  %v1135_v1 = vand.u32 2147483647, %v1131_v45  ;;  %v1136_v31 = vand.u32 2147483647, %v1132_v46  ;;  %vm1139_vm11 = vcmask 97280  }
  0xdb   :  { %v962_v50 = vadd.f32 %v961_v19, %v960_v40  ;;  %v1137_v4 = vand.u32 2147483647, %v1133_v53  ;;  %v969_v6 = vsel %vm915_vm6, %v910_v57, 0.0  ;;  %v1138_v3 = vand.u32 2147483647, %v1134_v35 }
  0xdc   :  { %v913_v8 = vand.u32 2147483647, %v881_v51  ;;  %v914_v20 = vand.u32 2147483647, %v882_v63  ;;  %v971_v42 = vsel %vm915_vm6, %v911_v27, 0.0  ;;  %v973_v21 = vsel %vm915_vm6, %v912_v59, 0.0 }
  0xdd   :  { %v964_v60 = vadd.f32 %v963_v44, %v962_v50  ;;  %v1140_v22 = vsel %vm1139_vm11, %v1135_v1, 0.0  ;;  %v1141_v23 = vsel %vm1139_vm11, %v1137_v4, 0.0  ;;  %v1143_v15 = vsel %vm1139_vm11, %v1136_v31, 0.0  ;;  %v1227_v30 = vld [vmem:[%s1564_s29 + $0x1] sm:$0x1] }
  0xde   :  { %v1299_v25 = vadd.f32 -1.0, %v1182_v13  ;;  %v1300_v49 = vadd.f32 -1.0, %v1183_v18  ;;  %v975_v32 = vsel %vm915_vm6, %v913_v8, 0.0  ;;  %v977_v19 = vsel %vm915_vm6, %v914_v20, 0.0 }
  0xdf   :  { %v966_v2 = vadd.f32 %v965_v55, %v964_v60  ;;  %v1142_v14 = vadd.f32 %v1141_v23, %v1140_v22  ;;  %v1303_v51 = vadd.f32 -1.0, %v1226_v29  ;;  %v1304_v40 = vadd.f32 -1.0, %v1227_v30 }
  0xe0   :  { %v1186_v38 = vmul.f32 %v1299_v25, %v1299_v25  ;;  %v1187_v39 = vmul.f32 %v1300_v49, %v1300_v49  ;;  %vm1188_vm12 = vcmask 139264   ;;  %vm1232_vm13 = vcmask 122880  }
  0xe1   :  { %v968_v12 = vadd.f32 %v967_v0, %v966_v2  ;;  %v1230_v46 = vmul.f32 %v1303_v51, %v1303_v51  ;;  %v1006_v22 = vrot.slane %v2065_v58, 4 }
  0xe2   :  { %v1189_v44 = vsel %vm1188_vm12, %v1186_v38, 0.0  ;;  %v1190_v45 = vsel %vm1188_vm12, %v1187_v39, 0.0 }
  0xe3   :  { %v970_v9 = vadd.f32 %v969_v6, %v968_v12  ;;  %v1191_v50 = vadd.f32 %v1190_v45, %v1189_v44  ;;  %v1233_v53 = vsel %vm1232_vm13, %v1230_v46, 0.0  ;;  %v1007_v49 = vadd.f32 %v1006_v22, %v2065_v58 }
  0xe5   :  { %v972_v28 = vadd.f32 %v971_v42, %v970_v9 }
  0xe7   :  { %v974_v34 = vadd.f32 %v973_v21, %v972_v28 }
  0xe9   :  { %v976_v24 = vadd.f32 %v975_v32, %v974_v34  ;;  %v1008_v34 = vrot.slane %v1007_v49, 2 }
  0xeb   :  { %v978_v41 = vadd.f32 %v977_v19, %v976_v24  ;;  %v1009_v58 = vadd.f32 %v1008_v34, %v1007_v49 }
  0xec   :  { %v357_v37 = vpop.xlane.xlu1 %356 }
  0xed   :  { %v358_v16 = vrot.slane %v357_v37, 4  ;;  %v979_v47 = vsel %vm915_vm6, %v978_v41, 0.0 }
  0xee   :  { %980 = vadd.xlane.f32.xlu0 %v979_v47 }
  0xef   :  { %v359_v52 = vadd.f32 %v358_v16, %v357_v37  ;;  %v250_v33 = vpop.xlane.xlu0 %249  ;;  %v1144_v37 = vsel %vm1139_vm11, %v1138_v3, 0.0 }
  0xf0   :  { %v251_v56 = vrot.slane %v250_v33, 4  ;;  %v1145_v36 = vadd.f32 %v1144_v37, %v1143_v15  ;;  %v1029_v15 = vrot.slane %v2081_v17, 4 }
  0xf1   :  { %v360_v54 = vrot.slane %v359_v52, 2 }
  0xf2   :  { %v252_v61 = vadd.f32 %v251_v56, %v250_v33  ;;  %v1147_v43 = vsel %vm1139_vm11, %v1145_v36, 0.0  ;;  %v1231_v33 = vmul.f32 %v1304_v40, %v1304_v40  ;;  %v1192_v56 = vsel %vm1188_vm12, %v1191_v50, 0.0 }
  0xf3   :  { %v361_v62 = vadd.f32 %v360_v54, %v359_v52  ;;  %v1146_v52 = vsel %vm1139_vm11, %v1142_v14, 0.0  ;;  %v1030_v29 = vadd.f32 %v1029_v15, %v2081_v17 }
  0xf4   :  { %v253_v5 = vrot.slane %v252_v61, 2  ;;  %v1148_v48 = vadd.f32 %v1147_v43, %v1146_v52  ;;  %v1234_v54 = vsel %vm1232_vm13, %v1231_v33, 0.0 }
  0xf5   :  { %v362_v7 = vrot.slane %v361_v62, 1  ;;  %v1235_v57 = vadd.f32 %v1234_v54, %v1233_v53  ;;  %v1031_v38 = vrot.slane %v1030_v29, 2 }
  0xf6   :  { %v254_v11 = vadd.f32 %v253_v5, %v252_v61  ;;  %1149 = vadd.xlane.f32.xlu0 %v1148_v48 }
  0xf7   :  { %v363_v26 = vadd.f32 %v362_v7, %v361_v62  ;;  %v1236_v27 = vsel %vm1232_vm13, %v1235_v57, 0.0  ;;  %v1032_v17 = vadd.f32 %v1031_v38, %v1030_v29 }
  0xf8   :  { %v255_v10 = vrot.slane %v254_v11, 1 }
  0xfa   :  { %v256_v16 = vadd.f32 %v255_v10, %v254_v11  ;;  %1193 = vadd.xlane.f32.xlu0 %v1192_v56  ;;  %v1010_v56 = vrot.slane %v1009_v58, 1 }
  0xfc   :  { %1307 = vpush %v256_v16 }
  0xfd   :  { %1309 = vpush %v363_v26 }
  0xfe   :  { %1237 = vadd.xlane.f32.xlu0 %v1236_v27 }
 0x10b   :  { %s1306_s29 = spop %1305 }
 0x10c   :  { %s149_s30 = smul.f32 0.001953125, %s1306_s29 }
 0x10e   :  { %1249 = sst [smem:[#allocation2]] %s149_s30 }
 0x10f   :  { %v777_v35 = vpop.xlane.xlu1 %776 }
 0x110   :  { %v778_v60 = vrot.slane %v777_v35, 4 }
 0x112   :  { %v779_v62 = vadd.f32 %v778_v60, %v777_v35  ;;  %v1033_v60 = vrot.slane %v1032_v17, 1 }
 0x114   :  { %v669_v55 = vpop.xlane.xlu0 %668  ;;  %v780_v1 = vrot.slane %v779_v62, 2 }
 0x115   :  { %v670_v59 = vrot.slane %v669_v55, 4 }
 0x116   :  { %v781_v6 = vadd.f32 %v780_v1, %v779_v62 }
 0x117   :  { %v671_v61 = vadd.f32 %v670_v59, %v669_v55 }
 0x118   :  { %v782_v12 = vrot.slane %v781_v6, 1  ;;  %v1089_v9 = vpop.xlane.xlu0 %1088 }
 0x119   :  { %v672_v63 = vrot.slane %v671_v61, 2  ;;  %v1090_v37 = vrot.slane %v1089_v9, 4 }
 0x11a   :  { %v783_v11 = vadd.f32 %v782_v12, %v781_v6 }
 0x11b   :  { %v673_v4 = vadd.f32 %v672_v63, %v671_v61  ;;  %v1091_v32 = vadd.f32 %v1090_v37, %v1089_v9 }
 0x11d   :  { %v674_v7 = vrot.slane %v673_v4, 1  ;;  %v1092_v24 = vrot.slane %v1091_v32, 2 }
 0x11f   :  { %v675_v18 = vadd.f32 %v674_v7, %v673_v4  ;;  %v1093_v53 = vadd.f32 %v1092_v24, %v1091_v32  ;;  %v1011_v4 = vadd.f32 %v1010_v56, %v1009_v58 }
 0x121   :  { %v1094_v1 = vrot.slane %v1093_v53, 1 }
 0x12d   :  { %s1308_s20 = spop %1307 }
 0x12e   :  { %s1310_s27 = spop %1309  ;;  %s258_s4 = smul.f32 0.001953125, %s1308_s20 }
 0x12f   :  { %s365_s16 = smul.f32 0.001953125, %s1310_s27 }
 0x131   :  { %s366_s22 = sadd.f32 %s365_s16, %s258_s4 }
 0x150   :  { %v561_v0 = vpop.xlane.xlu1 %560 }
 0x151   :  { %v562_v31 = vrot.slane %v561_v0, 4 }
 0x153   :  { %v563_v2 = vadd.f32 %v562_v31, %v561_v0 }
 0x154   :  { %v1065_v20 = vpop.xlane.xlu1 %1064 }
 0x155   :  { %v564_v5 = vrot.slane %v563_v2, 2  ;;  %v1066_v23 = vrot.slane %v1065_v20, 4 }
 0x157   :  { %v565_v3 = vadd.f32 %v564_v5, %v563_v2  ;;  %v1067_v26 = vadd.f32 %v1066_v23, %v1065_v20  ;;  %v1095_v20 = vadd.f32 %v1094_v1, %v1093_v53 }
 0x158   :  { %v1113_v42 = vpop.xlane.xlu1 %1112 }
 0x159   :  { %v566_v8 = vrot.slane %v565_v3, 1  ;;  %v1114_v10 = vrot.slane %v1113_v42, 4  ;;  %v1068_v14 = vrot.slane %v1067_v26, 2 }
 0x15b   :  { %v567_v13 = vadd.f32 %v566_v8, %v565_v3  ;;  %v1115_v30 = vadd.f32 %v1114_v10, %v1113_v42  ;;  %v1069_v44 = vadd.f32 %v1068_v14, %v1067_v26  ;;  %v1034_v8 = vadd.f32 %v1033_v60, %v1032_v17 }
 0x15c   :  { %v1172_v21 = vpop.xlane.xlu1 %1171 }
 0x15d   :  { %1311 = vpush %v567_v13  ;;  %v1173_v28 = vrot.slane %v1172_v21, 4  ;;  %v1116_v51 = vrot.slane %v1115_v30, 2  ;;  %v1070_v57 = vrot.slane %v1069_v44, 1 }
 0x15e   :  { %1313 = vpush %v675_v18 }
 0x15f   :  { %1315 = vpush %v783_v11  ;;  %v1174_v36 = vadd.f32 %v1173_v28, %v1172_v21  ;;  %v1117_v47 = vadd.f32 %v1116_v51, %v1115_v30  ;;  %v1071_v5 = vadd.f32 %v1070_v57, %v1069_v44 }
 0x160   :  { %v1216_v25 = vpop.xlane.xlu1 %1215 }
 0x161   :  { %v1217_v16 = vrot.slane %v1216_v25, 4  ;;  %v1175_v43 = vrot.slane %v1174_v36, 2  ;;  %v1118_v62 = vrot.slane %v1117_v47, 1 }
 0x163   :  { %v1218_v40 = vadd.f32 %v1217_v16, %v1216_v25  ;;  %v1176_v27 = vadd.f32 %v1175_v43, %v1174_v36  ;;  %v1119_v13 = vadd.f32 %v1118_v62, %v1117_v47 }
 0x165   :  { %v1219_v33 = vrot.slane %v1218_v40, 2  ;;  %v1177_v6 = vrot.slane %v1176_v27, 1 }
 0x167   :  { %v1220_v61 = vadd.f32 %v1219_v33, %v1218_v40  ;;  %v1178_v21 = vadd.f32 %v1177_v6, %v1176_v27 }
 0x169   :  { %v1221_v18 = vrot.slane %v1220_v61, 1 }
 0x16b   :  { %v1222_v15 = vadd.f32 %v1221_v18, %v1220_v61 }
 0x177   :  { %v981_v19 = vpop.xlane.xlu0 %980 }
 0x178   :  { %v982_v39 = vrot.slane %v981_v19, 4 }
 0x17a   :  { %v983_v41 = vadd.f32 %v982_v39, %v981_v19 }
 0x17c   :  { %v984_v45 = vrot.slane %v983_v41, 2 }
 0x17e   :  { %v985_v50 = vadd.f32 %v984_v45, %v983_v41 }
 0x17f   :  { %v1150_v52 = vpop.xlane.xlu0 %1149 }
 0x180   :  { %v1151_v46 = vrot.slane %v1150_v52, 4  ;;  %v986_v59 = vrot.slane %v985_v50, 1 }
 0x182   :  { %v1152_v48 = vadd.f32 %v1151_v46, %v1150_v52  ;;  %v987_v0 = vadd.f32 %v986_v59, %v985_v50 }
 0x183   :  { %v1194_v54 = vpop.xlane.xlu0 %1193 }
 0x184   :  { %v1153_v55 = vrot.slane %v1152_v48, 2  ;;  %v1195_v35 = vrot.slane %v1194_v54, 4  ;;  %1317 = vpush %v987_v0 }
 0x185   :  { %1319 = vpush %v1011_v4 }
 0x186   :  { %v1196_v63 = vadd.f32 %v1195_v35, %v1194_v54  ;;  %v1154_v31 = vadd.f32 %v1153_v55, %v1152_v48  ;;  %1321 = vpush %v1034_v8 }
 0x187   :  { %v1238_v2 = vpop.xlane.xlu0 %1237  ;;  %1323 = vpush %v1071_v5 }
 0x188   :  { %v1197_v3 = vrot.slane %v1196_v63, 2  ;;  %v1239_v7 = vrot.slane %v1238_v2, 4  ;;  %v1155_v12 = vrot.slane %v1154_v31, 1  ;;  %1325 = vpush %v1095_v20 }
 0x189   :  { %1327 = vpush %v1119_v13 }
 0x18a   :  { %v1240_v11 = vadd.f32 %v1239_v7, %v1238_v2  ;;  %v1198_v42 = vadd.f32 %v1197_v3, %v1196_v63  ;;  %v1156_v9 = vadd.f32 %v1155_v12, %v1154_v31 }
 0x18c   :  { %v1241_v22 = vrot.slane %v1240_v11, 2  ;;  %v1199_v23 = vrot.slane %v1198_v42, 1  ;;  %1329 = vpush %v1156_v9 }
 0x18d   :  { %1331 = vpush %v1178_v21 }
 0x18e   :  { %v1242_v10 = vadd.f32 %v1241_v22, %v1240_v11  ;;  %v1200_v37 = vadd.f32 %v1199_v23, %v1198_v42  ;;  %s1312_s15 = spop %1311 }
 0x18f   :  { %s569_s18 = smul.f32 0.001953125, %s1312_s15  ;;  %s1314_s23 = spop %1313 }
 0x190   :  { %1333 = vpush %v1200_v37  ;;  %v1243_v25 = vrot.slane %v1242_v10, 1  ;;  %s677_s28 = smul.f32 0.0026041667, %s1314_s23  ;;  %s1316_s1 = spop %1315 }
 0x191   :  { %1335 = vpush %v1222_v15  ;;  %s570_s26 = sadd.f32 %s569_s18, %s366_s22  ;;  %s785_s7 = smul.f32 0.0026041667, %s1316_s1 }
 0x192   :  { %v1244_v49 = vadd.f32 %v1243_v25, %v1242_v10 }
 0x193   :  { %s678_s2 = sadd.f32 %s677_s28, %s570_s26 }
 0x194   :  { %1337 = vpush %v1244_v49 }
 0x195   :  { %s786_s10 = sadd.f32 %s785_s7, %s678_s2 }
 0x1b5   :  { %s1318_s11 = spop %1317 }
 0x1b6   :  { %s989_s0 = smul.f32 0.0026041667, %s1318_s11  ;;  %s1320_s5 = spop %1319 }
 0x1b7   :  { %s1322_s9 = spop %1321  ;;  %s1013_s17 = smul.f32 0.00390625, %s1320_s5 }
 0x1b8   :  { %s990_s13 = sadd.f32 %s989_s0, %s786_s10  ;;  %s1324_s21 = spop %1323 }
 0x1b9   :  { %s1036_s8 = smul.f32 0.00390625, %s1322_s9  ;;  %s1326_s14 = spop %1325 }
 0x1ba   :  { %s1014_s25 = sadd.f32 %s1013_s17, %s990_s13  ;;  %s1073_s24 = smul.f32 0.00390625, %s1324_s21 }
 0x1bb   :  { %s1328_s3 = spop %1327  ;;  %s1097_s29 = smul.f32 0.0052083335, %s1326_s14 }
 0x1bc   :  { %s1037_s19 = sadd.f32 %s1036_s8, %s1014_s25  ;;  %s1121_s27 = smul.f32 0.0052083335, %s1328_s3 }
 0x1bd   :  { %s1330_s30 = spop %1329  ;;  %s1410_s5 = smov [#allocation2]  }
 0x1be   :  { %s1074_s12 = sadd.f32 %s1073_s24, %s1037_s19  ;;  %s1332_s4 = spop %1331 }
 0x1bf   :  { %s1158_s16 = smul.f32 0.0052083335, %s1330_s30 }
 0x1c0   :  { %s1098_s20 = sadd.f32 %s1097_s29, %s1074_s12  ;;  %s1180_s18 = smul.f32 0.020833334, %s1332_s4 }
 0x1c1   :  { %s1334_s22 = spop %1333 }
 0x1c2   :  { %s1122_s15 = sadd.f32 %s1121_s27, %s1098_s20  ;;  %s1202_s26 = smul.f32 0.027777778, %s1334_s22 }
 0x1c3   :  { %s1336_s28 = spop %1335 }
 0x1c4   :  { %s1159_s23 = sadd.f32 %s1158_s16, %s1122_s15  ;;  %s1224_s1 = smul.f32 0.015625, %s1336_s28 }
 0x1c5   :  { %s1203_s2 = sadd.f32 %s1202_s26, %s1180_s18  ;;  %s1338_s7 = spop %1337 }
 0x1c6   :  { %1251 = sst [smem:[#allocation2 + $0x1]] %s1159_s23  ;;  %s1246_s11 = smul.f32 0.03125, %s1338_s7 }
 0x1c7   :  { %s1225_s10 = sadd.f32 %s1224_s1, %s1203_s2 }
 0x1c9   :  { %s1247_s0 = sadd.f32 %s1246_s11, %s1225_s10 }
 0x1cb   :  { %1253 = sst [smem:[#allocation2 + $0x2]] %s1247_s0 }
 0x1cc   :  { %1261 = dma.smem_to_hbm %s1410_s5, 16, %s1569_s6, [#allocation3]  }
 0x1cd   :  { %1378 = dma.done.wait [#allocation3], 16  }
 0x1ce   :  { %1379 = vsyncadd [#allocation3], 4294967280 }
 0x1cf   :  { %1265 = sfence }
 0x1d0   :  { %1266 = vsyncpa [#allocation3], 1 }

</bundles_post_ra>
